<compile_context>
chip_gen: v7x
topology: tpu7x:2x2x1
jax: 0.10.0
libtpu: 0.0.40
codegen_flags: <defaults>
</compile_context>

<pallas_src>
import numpy as np
import jax
import jax.numpy as jnp
from jax.experimental import pallas as pl
from jax.experimental.pallas import tpu as pltpu

POINTS_MULTIRES = 10          # 3 + 3*2*10 = 63 features
DIRS_MULTIRES = 4             # 3 + 3*2*4  = 27 features
HIDDEN_DIMS = [128, 128, 128, 128]
OUT_DIM = 3

P_DIM = 3 + 3 * 2 * POINTS_MULTIRES
D_DIM = 3 + 3 * 2 * DIRS_MULTIRES
IN_DIM = P_DIM + D_DIM        # 90
K_PAD = 128                   # padded feature / hidden width (MXU & lane aligned)
K_IN = 32                     # packed bf16 input width: [hi(6) | mid(6) | lo(6) | 0..]
OUT_PAD = 8                   # narrow f32 output width (wrapper slices [:, :3])
N_LAYERS = len(HIDDEN_DIMS) + 1
TILE_N = 4096                 # default rows per grid step (sweep 2048-4096)
VMEM_LIMIT_BYTES = 48 * 1024 * 1024   # > 32 MiB default scoped, < 64 MiB v7x physical


def _round_up(x, m):
    return (x + m - 1) // m * m


def _build_embed_constants():
    """Frequency matrix + masks + phase for the lane-dense, single-sin embedding.

    Column c (0..89, NeRF get_embedder order: points then view_dirs) holds
        raw x_j                    if sel[0, c] == 1
        sin(x_j * 2^i + phase_c)   if sel[1, c] == 1   (phase_c = pi/2 on cos cols)
    Columns 90..127 are zero (both masks 0).  F has shape (K_IN, 128): rows
    0..5 / 6..11 / 12..17 carry the same per-column frequency for the hi / mid
    / lo bf16 split terms of [px,py,pz,dx,dy,dz]; remaining rows are zero.
    """
    F = np.zeros((K_IN, K_PAD), np.float32)
    sel = np.zeros((2, K_PAD), np.float32)
    phase = np.zeros((1, K_PAD), np.float32)

    def put(src, col, freq, is_raw, is_cos):
        for part in range(3):                  # hi / mid / lo split rows
            F[part * 6 + src, col] = freq
        if is_raw:
            sel[0, col] = 1.0
        else:
            sel[1, col] = 1.0
            if is_cos:
                phase[0, col] = np.pi / 2.0    # cos(x) = sin(x + pi/2)

    def fill(src0, start, multires):
        col = start
        for j in range(3):                     # raw coordinates
            put(src0 + j, col, 1.0, True, False); col += 1
        for i in range(multires):
            f = float(2.0 ** i)                # exact in bf16
            for j in range(3):                 # sin(2^i x_j)
                put(src0 + j, col, f, False, False); col += 1
            for j in range(3):                 # cos(2^i x_j)
                put(src0 + j, col, f, False, True); col += 1
        return col

    col = fill(0, 0, POINTS_MULTIRES)
    assert col == P_DIM
    col = fill(3, col, DIRS_MULTIRES)
    assert col == IN_DIM
    return F, sel, phase


_F_NP, _SEL_NP, _PHASE_NP = _build_embed_constants()


def _ir_kernel(xin_ref, f_ref, sel_ref, phase_ref, w_ref, b_ref, out_ref):
    # Embedding argument on the MXU: xin is the exact 3-term bf16 split of the
    # 6 coordinates, F carries power-of-two frequencies (exact in bf16), so
    # arg[:, c] = x_src(c) * 2^i to f32 accuracy with zero VPU broadcast work.
    arg = jnp.dot(xin_ref[...], f_ref[...],
                  preferred_element_type=jnp.float32)          # (TN, 128) f32

    sel = sel_ref[...]                                         # (2, 128) raw/trig masks
    # Single full-width transcendental pass (cos folded into sin via phase).
    h = sel[0:1, :] * arg + sel[1:2, :] * jnp.sin(arg + phase_ref[...])

    # 5-layer MLP: bf16 operands on the MXU, f32 accumulation / bias / ReLU.
    for li in range(N_LAYERS):
        w = w_ref[li]                                          # (128, 128) bf16
        b = b_ref[li]                                          # (1, 128)   f32
        z = jnp.dot(h.astype(jnp.bfloat16), w,
                    preferred_element_type=jnp.float32) + b
        h = jnp.maximum(z, 0.0) if li < N_LAYERS - 1 else z

    # Narrow writeback: only 8 f32 lanes per row go back to HBM (lanes 3..7 are
    # exact zeros thanks to the zero-padded last-layer weight columns).
    out_ref[...] = h[:, :OUT_PAD].astype(out_ref.dtype)


def _pack_params(params):
    """Pack flat [w0,b0,...,w4,b4] into one zero-padded (5,128,128) bf16 weight
    tensor and one (5,1,128) f32 bias tensor."""
    assert len(params) == 2 * N_LAYERS
    w_np = np.zeros((N_LAYERS, K_PAD, K_PAD), np.float32)
    b_np = np.zeros((N_LAYERS, 1, K_PAD), np.float32)
    for li in range(N_LAYERS):
        w = np.asarray(params[2 * li], np.float32)
        b = np.asarray(params[2 * li + 1], np.float32).reshape(-1)
        w_np[li, :w.shape[0], :w.shape[1]] = w
        b_np[li, 0, :b.shape[0]] = b
    return jnp.asarray(w_np, jnp.bfloat16), jnp.asarray(b_np, jnp.float32)


def prepare_ir_network(params):
    """One-time packing of weights + embedding constants (hoisted out of the
    forward path; reuse the returned dict across calls)."""
    w_packed, b_packed = _pack_params(params)
    return {
        "w": w_packed,
        "b": b_packed,
        "f": jnp.asarray(_F_NP, jnp.bfloat16),       # powers of two: exact in bf16
        "sel": jnp.asarray(_SEL_NP, jnp.float32),
        "phase": jnp.asarray(_PHASE_NP, jnp.float32),
    }


def _choose_tile_n(n, tile_n):
    tile_n = int(tile_n)
    tile_n = min(tile_n, max(n, 64))
    # Keep >= 2 grid steps on large inputs so both TensorCores (v7x) get work.
    while tile_n >= 2048 and (n + tile_n - 1) // tile_n < 2:
        tile_n //= 2
    return max(64, _round_up(tile_n, 64))      # sublane-aligned for f32 and bf16


def ir_network_forward(points, view_dirs, packed, *, tile_n=TILE_N):
    """points, view_dirs: (N, 3) float32.  packed: output of prepare_ir_network."""
    n = points.shape[0]
    tile_n = _choose_tile_n(n, tile_n)
    n_pad = _round_up(n, tile_n)

    # Exact 3-term bf16 split of the 6 coordinates -> one (N, 32) bf16 stream.
    x = jnp.concatenate([points, view_dirs], axis=-1).astype(jnp.float32)  # (N, 6)
    hi = x.astype(jnp.bfloat16)
    r1 = x - hi.astype(jnp.float32)
    mid = r1.astype(jnp.bfloat16)
    lo = (r1 - mid.astype(jnp.float32)).astype(jnp.bfloat16)
    xin = jnp.concatenate(
        [hi, mid, lo, jnp.zeros((n, K_IN - 18), jnp.bfloat16)], axis=-1)   # (N, 32)
    if n_pad != n:
        xin = jnp.pad(xin, ((0, n_pad - n), (0, 0)))

    grid = (n_pad // tile_n,)
    const2 = lambda i: (0, 0)
    const3 = lambda i: (0, 0, 0)

    out = pl.pallas_call(
        _ir_kernel,
        out_shape=jax.ShapeDtypeStruct((n_pad, OUT_PAD), jnp.float32),
        grid_spec=pltpu.PrefetchScalarGridSpec(
            num_scalar_prefetch=0,
            grid=grid,
            in_specs=[
                pl.BlockSpec((tile_n, K_IN), lambda i: (i, 0)),      # packed input tile
                pl.BlockSpec((K_IN, K_PAD), const2),                 # F      (resident)
                pl.BlockSpec((2, K_PAD), const2),                    # sel    (resident)
                pl.BlockSpec((1, K_PAD), const2),                    # phase  (resident)
                pl.BlockSpec((N_LAYERS, K_PAD, K_PAD), const3),      # weights(resident)
                pl.BlockSpec((N_LAYERS, 1, K_PAD), const3),          # biases (resident)
            ],
            out_specs=pl.BlockSpec((tile_n, OUT_PAD), lambda i: (i, 0)),
        ),
        compiler_params=pltpu.CompilerParams(
            dimension_semantics=("parallel",),
            vmem_limit_bytes=VMEM_LIMIT_BYTES),
    )(xin, packed["f"], packed["sel"], packed["phase"], packed["w"], packed["b"])

    return out[:n, :OUT_DIM]


# ----------------------------- test utilities -------------------------------

def init_params(key):
    """Deterministic synthetic parameters with the same shapes as the PyTorch module."""
    dims_in = [IN_DIM] + HIDDEN_DIMS
    dims_out = HIDDEN_DIMS + [OUT_DIM]
    params = []
    for din, dout in zip(dims_in, dims_out):
        key, kw, kb = jax.random.split(key, 3)
        scale = 1.0 / jnp.sqrt(jnp.float32(din))
        w = jax.random.uniform(kw, (din, dout), jnp.float32, -scale, scale)
        b = jax.random.uniform(kb, (1, dout), jnp.float32, -scale, scale)
        params += [w, b]
    return params


def _embed_ref(x, multires):
    feats = [x]
    for i in range(multires):
        f = 2.0 ** i
        feats.append(jnp.sin(x * f))
        feats.append(jnp.cos(x * f))
    return jnp.concatenate(feats, axis=-1)


def reference_forward(points, view_dirs, params, matmul_dtype=jnp.float32):
    h = jnp.concatenate([_embed_ref(points, POINTS_MULTIRES),
                         _embed_ref(view_dirs, DIRS_MULTIRES)], axis=-1)
    for li in range(N_LAYERS):
        w = params[2 * li]
        b = params[2 * li + 1]
        z = jnp.dot(h.astype(matmul_dtype), w.astype(matmul_dtype),
                    preferred_element_type=jnp.float32) + b
        h = jnp.maximum(z, 0.0) if li < N_LAYERS - 1 else z
    return h


if __name__ == "__main__":
    key = jax.random.PRNGKey(0)
    key, kparam = jax.random.split(key)
    params = init_params(kparam)
    packed = prepare_ir_network(params)          # hoisted: packed once, reused

    forward = jax.jit(ir_network_forward, static_argnames=("tile_n",))

    # Single-tile case, explicit small multi-tile case, and the default tile
    # path (exercises the tile chooser, row padding and 2-step grid).
    for n, tile_n in ((64, 64), (600, 256), (2500, TILE_N)):
        key, kp, kd = jax.random.split(key, 3)
        points = jax.random.normal(kp, (n, 3), jnp.float32)
        view_dirs = jax.random.normal(kd, (n, 3), jnp.float32)
        view_dirs = view_dirs / jnp.linalg.norm(view_dirs, axis=-1, keepdims=True)

        out = jax.block_until_ready(
            forward(points, view_dirs, packed, tile_n=tile_n))
        assert out.shape == (n, OUT_DIM)

        # Check against a reference with matching bf16-matmul numerics.
        ref_bf16 = reference_forward(points, view_dirs, params,
                                     matmul_dtype=jnp.bfloat16)
        assert jnp.allclose(out, ref_bf16, atol=2e-2, rtol=2e-2), \
            "Pallas output mismatch vs bf16-matmul reference"

        # Loose semantic sanity check against the full-f32 module math.
        ref_f32 = reference_forward(points, view_dirs, params,
                                    matmul_dtype=jnp.float32)
        assert jnp.allclose(out, ref_f32, atol=1e-1, rtol=1e-1), \
            "Pallas output mismatch vs f32 reference"

    print("KERNEL_OK")
</pallas_src>

<mosaic_0001>
module attributes {stable_mosaic.version = 11 : i64} {
  func.func @_ir_kernel(%arg0: i32, %arg1: memref<64x32xbf16, #tpu.memory_space<vmem>>, %arg2: memref<32x128xbf16, #tpu.memory_space<vmem>>, %arg3: memref<2x128xf32, #tpu.memory_space<vmem>>, %arg4: memref<1x128xf32, #tpu.memory_space<vmem>>, %arg5: memref<5x128x128xbf16, #tpu.memory_space<vmem>>, %arg6: memref<5x1x128xf32, #tpu.memory_space<vmem>>, %arg7: memref<64x8xf32, #tpu.memory_space<vmem>>) attributes {dimension_semantics = [#tpu.dimension_semantics<parallel>], iteration_bounds = array<i64: 1>, scalar_prefetch = 0 : i64, scratch_operands = 0 : i64, tpu.core_type = #tpu.core_type<tc>, window_params = [{transform_indices = @transform_0, window_bounds = array<i64: 64, 32>}, {pipeline_mode = #tpu.pipeline_mode<synchronous>, transform_indices = @transform_1, window_bounds = array<i64: 32, 128>}, {pipeline_mode = #tpu.pipeline_mode<synchronous>, transform_indices = @transform_2, window_bounds = array<i64: 2, 128>}, {pipeline_mode = #tpu.pipeline_mode<synchronous>, transform_indices = @transform_3, window_bounds = array<i64: 1, 128>}, {pipeline_mode = #tpu.pipeline_mode<synchronous>, transform_indices = @transform_4, window_bounds = array<i64: 5, 128, 128>}, {pipeline_mode = #tpu.pipeline_mode<synchronous>, transform_indices = @transform_5, window_bounds = array<i64: 5, 1, 128>}, {transform_indices = @transform_6, window_bounds = array<i64: 64, 8>}]} {
    %c0 = arith.constant 0 : index
    %c0_0 = arith.constant 0 : index
    %0 = vector.load %arg1[%c0, %c0_0] : memref<64x32xbf16, #tpu.memory_space<vmem>>, vector<64x32xbf16>
    %c0_1 = arith.constant 0 : index
    %c0_2 = arith.constant 0 : index
    %1 = vector.load %arg2[%c0_1, %c0_2] : memref<32x128xbf16, #tpu.memory_space<vmem>>, vector<32x128xbf16>
    %cst = arith.constant dense<0.000000e+00> : vector<64x128xf32>
    %2 = tpu.matmul %0, %1, %cst {dimension_numbers = #tpu.dot_dimension_numbers<[1], [0], [0], [1], [0, 0, 1, 1], [], []>} : vector<64x32xbf16>, vector<32x128xbf16>, vector<64x128xf32> -> vector<64x128xf32>
    %c0_3 = arith.constant 0 : index
    %c0_4 = arith.constant 0 : index
    %3 = vector.load %arg3[%c0_3, %c0_4] : memref<2x128xf32, #tpu.memory_space<vmem>>, vector<2x128xf32>
    %4 = vector.extract_strided_slice %3 {offsets = [0, 0], sizes = [1, 128], strides = [1, 1]} : vector<2x128xf32> to vector<1x128xf32>
    %5 = vector.broadcast %4 : vector<1x128xf32> to vector<64x128xf32>
    %6 = arith.mulf %5, %2 : vector<64x128xf32>
    %7 = vector.extract_strided_slice %3 {offsets = [1, 0], sizes = [1, 128], strides = [1, 1]} : vector<2x128xf32> to vector<1x128xf32>
    %c0_5 = arith.constant 0 : index
    %c0_6 = arith.constant 0 : index
    %8 = vector.load %arg4[%c0_5, %c0_6] : memref<1x128xf32, #tpu.memory_space<vmem>>, vector<1x128xf32>
    %9 = vector.broadcast %8 : vector<1x128xf32> to vector<64x128xf32>
    %10 = arith.addf %2, %9 : vector<64x128xf32>
    %11 = math.sin %10 : vector<64x128xf32>
    %12 = vector.broadcast %7 : vector<1x128xf32> to vector<64x128xf32>
    %13 = arith.mulf %12, %11 : vector<64x128xf32>
    %14 = arith.addf %6, %13 : vector<64x128xf32>
    %c0_7 = arith.constant 0 : index
    %c0_8 = arith.constant 0 : index
    %c0_9 = arith.constant 0 : index
    %15 = vector.load %arg5[%c0_7, %c0_8, %c0_9] : memref<5x128x128xbf16, #tpu.memory_space<vmem>>, vector<1x128x128xbf16>
    %16 = vector.shape_cast %15 : vector<1x128x128xbf16> to vector<128x128xbf16>
    %c0_10 = arith.constant 0 : index
    %c0_11 = arith.constant 0 : index
    %c0_12 = arith.constant 0 : index
    %17 = vector.load %arg6[%c0_10, %c0_11, %c0_12] : memref<5x1x128xf32, #tpu.memory_space<vmem>>, vector<1x1x128xf32>
    %18 = vector.shape_cast %17 : vector<1x1x128xf32> to vector<1x128xf32>
    %19 = arith.truncf %14 : vector<64x128xf32> to vector<64x128xbf16>
    %cst_13 = arith.constant dense<0.000000e+00> : vector<64x128xf32>
    %20 = tpu.matmul %19, %16, %cst_13 {dimension_numbers = #tpu.dot_dimension_numbers<[1], [0], [0], [1], [0, 0, 1, 1], [], []>} : vector<64x128xbf16>, vector<128x128xbf16>, vector<64x128xf32> -> vector<64x128xf32>
    %21 = vector.broadcast %18 : vector<1x128xf32> to vector<64x128xf32>
    %22 = arith.addf %20, %21 : vector<64x128xf32>
    %cst_14 = arith.constant 0.000000e+00 : f32
    %23 = vector.broadcast %cst_14 : f32 to vector<64x128xf32>
    %24 = arith.maximumf %22, %23 : vector<64x128xf32>
    %c1 = arith.constant 1 : index
    %c0_15 = arith.constant 0 : index
    %c0_16 = arith.constant 0 : index
    %25 = vector.load %arg5[%c1, %c0_15, %c0_16] : memref<5x128x128xbf16, #tpu.memory_space<vmem>>, vector<1x128x128xbf16>
    %26 = vector.shape_cast %25 : vector<1x128x128xbf16> to vector<128x128xbf16>
    %c1_17 = arith.constant 1 : index
    %c0_18 = arith.constant 0 : index
    %c0_19 = arith.constant 0 : index
    %27 = vector.load %arg6[%c1_17, %c0_18, %c0_19] : memref<5x1x128xf32, #tpu.memory_space<vmem>>, vector<1x1x128xf32>
    %28 = vector.shape_cast %27 : vector<1x1x128xf32> to vector<1x128xf32>
    %29 = arith.truncf %24 : vector<64x128xf32> to vector<64x128xbf16>
    %cst_20 = arith.constant dense<0.000000e+00> : vector<64x128xf32>
    %30 = tpu.matmul %29, %26, %cst_20 {dimension_numbers = #tpu.dot_dimension_numbers<[1], [0], [0], [1], [0, 0, 1, 1], [], []>} : vector<64x128xbf16>, vector<128x128xbf16>, vector<64x128xf32> -> vector<64x128xf32>
    %31 = vector.broadcast %28 : vector<1x128xf32> to vector<64x128xf32>
    %32 = arith.addf %30, %31 : vector<64x128xf32>
    %cst_21 = arith.constant 0.000000e+00 : f32
    %33 = vector.broadcast %cst_21 : f32 to vector<64x128xf32>
    %34 = arith.maximumf %32, %33 : vector<64x128xf32>
    %c2 = arith.constant 2 : index
    %c0_22 = arith.constant 0 : index
    %c0_23 = arith.constant 0 : index
    %35 = vector.load %arg5[%c2, %c0_22, %c0_23] : memref<5x128x128xbf16, #tpu.memory_space<vmem>>, vector<1x128x128xbf16>
    %36 = vector.shape_cast %35 : vector<1x128x128xbf16> to vector<128x128xbf16>
    %c2_24 = arith.constant 2 : index
    %c0_25 = arith.constant 0 : index
    %c0_26 = arith.constant 0 : index
    %37 = vector.load %arg6[%c2_24, %c0_25, %c0_26] : memref<5x1x128xf32, #tpu.memory_space<vmem>>, vector<1x1x128xf32>
    %38 = vector.shape_cast %37 : vector<1x1x128xf32> to vector<1x128xf32>
    %39 = arith.truncf %34 : vector<64x128xf32> to vector<64x128xbf16>
    %cst_27 = arith.constant dense<0.000000e+00> : vector<64x128xf32>
    %40 = tpu.matmul %39, %36, %cst_27 {dimension_numbers = #tpu.dot_dimension_numbers<[1], [0], [0], [1], [0, 0, 1, 1], [], []>} : vector<64x128xbf16>, vector<128x128xbf16>, vector<64x128xf32> -> vector<64x128xf32>
    %41 = vector.broadcast %38 : vector<1x128xf32> to vector<64x128xf32>
    %42 = arith.addf %40, %41 : vector<64x128xf32>
    %cst_28 = arith.constant 0.000000e+00 : f32
    %43 = vector.broadcast %cst_28 : f32 to vector<64x128xf32>
    %44 = arith.maximumf %42, %43 : vector<64x128xf32>
    %c3 = arith.constant 3 : index
    %c0_29 = arith.constant 0 : index
    %c0_30 = arith.constant 0 : index
    %45 = vector.load %arg5[%c3, %c0_29, %c0_30] : memref<5x128x128xbf16, #tpu.memory_space<vmem>>, vector<1x128x128xbf16>
    %46 = vector.shape_cast %45 : vector<1x128x128xbf16> to vector<128x128xbf16>
    %c3_31 = arith.constant 3 : index
    %c0_32 = arith.constant 0 : index
    %c0_33 = arith.constant 0 : index
    %47 = vector.load %arg6[%c3_31, %c0_32, %c0_33] : memref<5x1x128xf32, #tpu.memory_space<vmem>>, vector<1x1x128xf32>
    %48 = vector.shape_cast %47 : vector<1x1x128xf32> to vector<1x128xf32>
    %49 = arith.truncf %44 : vector<64x128xf32> to vector<64x128xbf16>
    %cst_34 = arith.constant dense<0.000000e+00> : vector<64x128xf32>
    %50 = tpu.matmul %49, %46, %cst_34 {dimension_numbers = #tpu.dot_dimension_numbers<[1], [0], [0], [1], [0, 0, 1, 1], [], []>} : vector<64x128xbf16>, vector<128x128xbf16>, vector<64x128xf32> -> vector<64x128xf32>
    %51 = vector.broadcast %48 : vector<1x128xf32> to vector<64x128xf32>
    %52 = arith.addf %50, %51 : vector<64x128xf32>
    %cst_35 = arith.constant 0.000000e+00 : f32
    %53 = vector.broadcast %cst_35 : f32 to vector<64x128xf32>
    %54 = arith.maximumf %52, %53 : vector<64x128xf32>
    %c4 = arith.constant 4 : index
    %c0_36 = arith.constant 0 : index
    %c0_37 = arith.constant 0 : index
    %55 = vector.load %arg5[%c4, %c0_36, %c0_37] : memref<5x128x128xbf16, #tpu.memory_space<vmem>>, vector<1x128x128xbf16>
    %56 = vector.shape_cast %55 : vector<1x128x128xbf16> to vector<128x128xbf16>
    %c4_38 = arith.constant 4 : index
    %c0_39 = arith.constant 0 : index
    %c0_40 = arith.constant 0 : index
    %57 = vector.load %arg6[%c4_38, %c0_39, %c0_40] : memref<5x1x128xf32, #tpu.memory_space<vmem>>, vector<1x1x128xf32>
    %58 = vector.shape_cast %57 : vector<1x1x128xf32> to vector<1x128xf32>
    %59 = arith.truncf %54 : vector<64x128xf32> to vector<64x128xbf16>
    %cst_41 = arith.constant dense<0.000000e+00> : vector<64x128xf32>
    %60 = tpu.matmul %59, %56, %cst_41 {dimension_numbers = #tpu.dot_dimension_numbers<[1], [0], [0], [1], [0, 0, 1, 1], [], []>} : vector<64x128xbf16>, vector<128x128xbf16>, vector<64x128xf32> -> vector<64x128xf32>
    %61 = vector.broadcast %58 : vector<1x128xf32> to vector<64x128xf32>
    %62 = arith.addf %60, %61 : vector<64x128xf32>
    %63 = vector.extract_strided_slice %62 {offsets = [0, 0], sizes = [64, 8], strides = [1, 1]} : vector<64x128xf32> to vector<64x8xf32>
    %c0_42 = arith.constant 0 : index
    %c0_43 = arith.constant 0 : index
    %64 = vector.load %arg7[%c0_42, %c0_43] : memref<64x8xf32, #tpu.memory_space<vmem>>, vector<64x8xf32>
    tpu.vector_store %arg7[%c0_42, %c0_43], %63 {strides = array<i32>} : memref<64x8xf32, #tpu.memory_space<vmem>>, vector<64x8xf32>,
    return
  }
  func.func @transform_0(%arg0: i32) -> (i32, i32) {
    %c0_i32 = arith.constant 0 : i32
    %c0_i32_0 = arith.constant 0 : i32
    return %arg0, %c0_i32 : i32, i32
  }
  func.func @transform_1(%arg0: i32) -> (i32, i32) {
    %c0_i32 = arith.constant 0 : i32
    %c0_i32_0 = arith.constant 0 : i32
    %c0_i32_1 = arith.constant 0 : i32
    return %c0_i32, %c0_i32_0 : i32, i32
  }
  func.func @transform_2(%arg0: i32) -> (i32, i32) {
    %c0_i32 = arith.constant 0 : i32
    %c0_i32_0 = arith.constant 0 : i32
    %c0_i32_1 = arith.constant 0 : i32
    return %c0_i32, %c0_i32_0 : i32, i32
  }
  func.func @transform_3(%arg0: i32) -> (i32, i32) {
    %c0_i32 = arith.constant 0 : i32
    %c0_i32_0 = arith.constant 0 : i32
    %c0_i32_1 = arith.constant 0 : i32
    return %c0_i32, %c0_i32_0 : i32, i32
  }
  func.func @transform_4(%arg0: i32) -> (i32, i32, i32) {
    %c0_i32 = arith.constant 0 : i32
    %c0_i32_0 = arith.constant 0 : i32
    %c0_i32_1 = arith.constant 0 : i32
    %c0_i32_2 = arith.constant 0 : i32
    return %c0_i32, %c0_i32_0, %c0_i32_1 : i32, i32, i32
  }
  func.func @transform_5(%arg0: i32) -> (i32, i32, i32) {
    %c0_i32 = arith.constant 0 : i32
    %c0_i32_0 = arith.constant 0 : i32
    %c0_i32_1 = arith.constant 0 : i32
    %c0_i32_2 = arith.constant 0 : i32
    return %c0_i32, %c0_i32_0, %c0_i32_1 : i32, i32, i32
  }
  func.func @transform_6(%arg0: i32) -> (i32, i32) {
    %c0_i32 = arith.constant 0 : i32
    %c0_i32_0 = arith.constant 0 : i32
    return %arg0, %c0_i32 : i32, i32
  }
}

</mosaic_0001>

<bundles_post_ra>
// kernel: ir_network_forward.1
= control target key start
LH: loop header
LB: loop body
LE: loop exit
PB: predicated region body
PF: predicated region fallthrough
CT: control target
= control target key end

     0   :  { %vm68_vm0 = vcmask 261120   ;;  %v2250_v44 = vmov 683565275   ;;  %v3242_v48 = vmov 2475754826   ;;  %s3227_s1 = inlined_call_operand.vmem [shape: bf16[32,128], index: 1, kind: input, shape index: {}]   ;;  %s3228_s0 = inlined_call_operand.vmem [shape: bf16[64,32], index: 0, kind: input, shape index: {}]   ;;  %s3229_s3 = inlined_call_operand.vmem [shape: f32[1,128], index: 3, kind: input, shape index: {}]   ;;  %s3230_s2 = inlined_call_operand.vmem [shape: f32[2,128], index: 2, kind: input, shape index: {}]   ;;  %s3231_s4 = inlined_call_operand.vmem [shape: bf16[5,128,128], index: 4, kind: input, shape index: {}]   ;;  %s3232_s5 = inlined_call_operand.vmem [shape: f32[5,1,128], index: 5, kind: input, shape index: {}]   ;;  %s3233_s6 = inlined_call_operand.vmem [shape: f32[64,8], index: 6, kind: output, shape index: {}]  }
   0x1   :  { %v2171_v0 = vld [vmem:[%s3227_s1] sm:$0xff]   ;;  %v2172_v1 = vld [vmem:[%s3227_s1 + $0x8] sm:$0xff]   ;;  %v2175_v4 = vld [vmem:[%s3228_s0 + $0x10] sm:$0xff]   ;;  %v3238_v50 = vmov 2131351028  }
   0x2   :  { %2001 = vmatprep.subr.bf16.mxu0 %v2171_v0  ;;  %v2173_v2 = vld [vmem:[%s3228_s0] sm:$0xff]   ;;  %v2174_v3 = vld [vmem:[%s3228_s0 + $0x8] sm:$0xff]   ;;  %v2176_v5 = vld [vmem:[%s3228_s0 + $0x18] sm:$0xff]   ;;  %v3240_v52 = vmov 2102212464  }
   0x3   :  { %2002 = vmatpush3.bf16.msra.mxu0 %v2171_v0  ;;  %2005 = vmatprep.mubr.msk.bf16.mxu0 %vm68_vm0, %v2173_v2  ;;  %v2312_v6 = vld [vmem:[%s3229_s3] ss:$0 sm:$0xff]  ;;  %v2254_v54 = vmov 920167782   ;;  %v2255_v61 = vmov 1326507024  }
   0x4   :  { %2003 = vmatprep.subr.bf16.mxu0 %v2172_v1 }
   0x7   :  { %2004 = vmatpush3.bf16.msra.mxu0 %v2172_v1 }
   0xa   :  { %2006 = vmatmul.mubr.msk.bf16.vlgmr.msra.gmra.mrb[0].mxu0 %vm68_vm0, %v2174_v3 }
   0xb   :  { %2009 = vmatprep.mubr.msk.bf16.mxu0 %vm68_vm0, %v2175_v4 }
  0x12   :  { %2010 = vmatmul.mubr.msk.bf16.gmra.mrb[4].mxu0 %vm68_vm0, %v2176_v5 }
  0xdd   :  { %v2314_v7 = vpop.f32.mrb[0].mxu0 }
  0xde   :  { %v2318_v8 = vadd.f32 %v2314_v7, %v2312_v6  ;;  %v2320_v9 = vpop.f32.mrb[1].mxu0 }
  0xdf   :  { %v2324_v10 = vadd.f32 %v2312_v6, %v2320_v9  ;;  %v2326_v11 = vpop.f32.mrb[2].mxu0 }
  0xe0   :  { %v382_v12 = vand.u32 2147483647, %v2318_v8  ;;  %v385_v13 = vand.u32 2139095040, %v2318_v8  ;;  %v2330_v14 = vpop.f32.mrb[3].mxu0  ;;  %v2336_v18 = vadd.f32 %v2326_v11, %v2312_v6 }
  0xe1   :  { %v174_v15 = vand.u32 2147483647, %v2324_v10  ;;  %v177_v16 = vand.u32 2139095040, %v2324_v10 }
  0xe2   :  { %v386_v17 = vshrl.u32 %v385_v13, 23  ;;  %v389_v19 = vand.u32 8388607, %v382_v12  ;;  %v489_v24 = vand.u32 2139095040, %v2336_v18  ;;  %v486_v42 = vand.u32 2147483647, %v2336_v18 }
  0xe3   :  { %v178_v20 = vshrl.u32 %v177_v16, 23  ;;  %v181_v21 = vand.u32 8388607, %v174_v15 }
  0xe4   :  { %v1798_v22 = vadd.s32 4294967169, %v386_v17  ;;  %v390_v27 = vor.u32 8388608, %v389_v19  ;;  %v490_v30 = vshrl.u32 %v489_v24, 23 }
  0xe5   :  { %v1790_v23 = vadd.s32 4294967169, %v178_v20  ;;  %v2343_v25 = vpop.f32.mrb[4].mxu0  ;;  %v182_v28 = vor.u32 8388608, %v181_v21 }
  0xe6   :  { %v392_v26 = vadd.s32 1, %v1798_v22  ;;  %v2345_v31 = vpop.f32.mrb[5].mxu0  ;;  %v1802_v34 = vadd.s32 4294967169, %v490_v30  ;;  %v2351_v39 = vshll.u32 %v390_v27, 8 }
  0xe7   :  { %v184_v29 = vadd.s32 1, %v1790_v23  ;;  %v2347_v32 = vpop.f32.mrb[6].mxu0  ;;  %v2355_v41 = vshll.u32 %v182_v28, 8 }
  0xe8   :  { %vm393_vm1 = vcmp.gt.s32.totalorder %v392_v26, 0  ;;  %v2349_v35 = vpop.f32.mrb[7].mxu0  ;;  %v2359_v47 = vadd.s32 1, %v1802_v34 }
  0xe9   :  { %v394_v33 = vsel %vm393_vm1, %v392_v26, 0  ;;  %vm185_vm2 = vcmp.gt.s32.totalorder %v184_v29, 0 }
  0xea   :  { %v395_v36 = vshrl.u32 %v394_v33, 5  ;;  %v396_v37 = vand.u32 31, %v394_v33  ;;  %v186_v38 = vsel %vm185_vm2, %v184_v29, 0  ;;  %vm497_vm12 = vcmp.gt.s32.totalorder %v2359_v47, 0 }
  0xeb   :  { %v2353_v40 = vshrl.u32 %v186_v38, 5  ;;  %v188_v46 = vand.u32 31, %v186_v38 }
  0xec   :  { %v397_v43 = vsub.s32 32, %v396_v37  ;;  %v399_v45 = vshll.u32 %v2250_v44, %v396_v37  ;;  %v402_v49 = vshll.u32 %v3242_v48, %v396_v37  ;;  %v405_v51 = vshll.u32 %v3238_v50, %v396_v37 }
  0xed   :  { %v408_v53 = vshll.u32 %v3240_v52, %v396_v37  ;;  %v411_v55 = vshll.u32 %v2254_v54, %v396_v37  ;;  %vm414_vm3 = vcmp.lt.s32.totalorder %v395_v36, 1  ;;  %vm415_vm4 = vcmp.lt.s32.totalorder %v395_v36, 2 }
  0xee   :  { %v400_v56 = vshrl.u32 %v3242_v48, %v397_v43  ;;  %v403_v57 = vshrl.u32 %v3238_v50, %v397_v43  ;;  %v406_v58 = vshrl.u32 %v3240_v52, %v397_v43  ;;  %v398_v59 = vshrl.u32 %v2250_v44, %v397_v43 }
  0xef   :  { %v409_v60 = vshrl.u32 %v2254_v54, %v397_v43  ;;  %v412_v62 = vshrl.u32 %v2255_v61, %v397_v43  ;;  %v189_v2 = vsub.s32 32, %v188_v46  ;;  %vm416_vm5 = vcmp.lt.s32.totalorder %v395_v36, 3 }
  0xf0   :  { %v401_v63 = vor.u32 %v400_v56, %v399_v45  ;;  %v404_v0 = vor.u32 %v403_v57, %v402_v49  ;;  %v407_v1 = vor.u32 %v406_v58, %v405_v51  ;;  %vm417_vm6 = vcmp.lt.s32.totalorder %v395_v36, 4 }
  0xf1   :  { %v410_v3 = vor.u32 %v409_v60, %v408_v53  ;;  %v413_v4 = vor.u32 %v412_v62, %v411_v55  ;;  %v191_v22 = vshll.u32 %v2250_v44, %v188_v46  ;;  %v192_v26 = vshrl.u32 %v3242_v48, %v189_v2 }
  0xf2   :  { %v418_v5 = vsel %vm414_vm3, %v398_v59, %v401_v63  ;;  %v419_v13 = vsel %vm417_vm6, %v407_v1, 2102212464  ;;  %v422_v16 = vsel %vm414_vm3, %v401_v63, %v404_v0  ;;  %v426_v17 = vsel %vm414_vm3, %v404_v0, %v407_v1 }
  0xf3   :  { %v420_v19 = vsel %vm416_vm5, %v404_v0, %v419_v13  ;;  %v423_v20 = vsel %vm417_vm6, %v410_v3, 920167782  ;;  %v427_v21 = vsel %vm417_vm6, %v413_v4, 1326507024  ;;  %v194_v27 = vshll.u32 %v3242_v48, %v188_v46 }
  0xf4   :  { %v424_v23 = vsel %vm416_vm5, %v407_v1, %v423_v20  ;;  %v428_v24 = vsel %vm416_vm5, %v410_v3, %v427_v21  ;;  %v421_v28 = vsel %vm415_vm4, %v418_v5, %v420_v19  ;;  %v195_v33 = vshrl.u32 %v3238_v50, %v189_v2 }
  0xf5   :  { %v425_v29 = vsel %vm415_vm4, %v422_v16, %v424_v23  ;;  %v429_v30 = vsel %vm415_vm4, %v426_v17, %v428_v24  ;;  %v193_v45 = vor.u32 %v192_v26, %v191_v22  ;;  %v197_v51 = vshll.u32 %v3238_v50, %v188_v46 }
  0xf6   :  { %v2382_v34 = vmul.u32.u64.low %v2351_v39, %v429_v30  ;;  %v2383_v37 = vmul.u32.u64.high %v2351_v39, %v429_v30, %v2382_v34  ;;  %v2386_v38 = vmul.u32.u64.low %v2351_v39, %v425_v29  ;;  %v2387_v43 = vmul.u32.u64.high %v2351_v39, %v425_v29, %v2386_v38 }
  0xf7   :  { %v196_v49 = vor.u32 %v195_v33, %v194_v27  ;;  %v198_v53 = vshrl.u32 %v3240_v52, %v189_v2  ;;  %v190_v36 = vshrl.u32 %v2250_v44, %v189_v2  ;;  %v200_v55 = vshll.u32 %v3240_v52, %v188_v46 }
  0xf8   :  { %v201_v56 = vshrl.u32 %v2254_v54, %v189_v2  ;;  %v204_v57 = vshrl.u32 %v2255_v61, %v189_v2  ;;  %v437_v58 = vmul.u32 %v2351_v39, %v421_v28  ;;  %v203_v60 = vshll.u32 %v2254_v54, %v188_v46 }
  0xf9   :  { %v199_v59 = vor.u32 %v198_v53, %v197_v51  ;;  %vm206_vm7 = vcmp.lt.s32.totalorder %v2353_v40, 1  ;;  %vm439_vm8 = vc.u32 %v2383_v37, %v2386_v38  ;;  %v440_v62 = vadd.s32 1, %v2387_v43 }
  0xfa   :  { %v202_v63 = vor.u32 %v201_v56, %v200_v55  ;;  %vm207_vm9 = vcmp.lt.s32.totalorder %v2353_v40, 2  ;;  %v205_v0 = vor.u32 %v204_v57, %v203_v60  ;;  %vm208_vm10 = vcmp.lt.s32.totalorder %v2353_v40, 3 }
  0xfb   :  { %vm209_vm11 = vcmp.lt.s32.totalorder %v2353_v40, 4  ;;  %v214_v1 = vsel %vm206_vm7, %v193_v45, %v196_v49  ;;  %v441_v39 = vsel %vm439_vm8, %v440_v62, %v2387_v43  ;;  %v218_v3 = vsel %vm206_vm7, %v196_v49, %v199_v59 }
  0xfc   :  { %v211_v2 = vsel %vm209_vm11, %v199_v59, 2102212464  ;;  %v215_v46 = vsel %vm209_vm11, %v202_v63, 920167782  ;;  %v442_v4 = vadd.s32 %v441_v39, %v437_v58  ;;  %v210_v5 = vsel %vm206_vm7, %v190_v36, %v193_v45 }
  0xfd   :  { %v216_v13 = vsel %vm208_vm10, %v199_v59, %v215_v46  ;;  %v219_v16 = vsel %vm209_vm11, %v205_v0, 1326507024  ;;  %v212_v17 = vsel %vm208_vm10, %v196_v49, %v211_v2  ;;  %v493_v28 = vand.u32 8388607, %v486_v42 }
  0xfe   :  { %v217_v19 = vsel %vm207_vm9, %v214_v1, %v216_v13  ;;  %v220_v20 = vsel %vm208_vm10, %v202_v63, %v219_v16  ;;  %v443_v21 = vadd.s32 536870912, %v442_v4  ;;  %v498_v29 = vsel %vm497_vm12, %v2359_v47, 0 }
  0xff   :  { %v221_v22 = vsel %vm207_vm9, %v218_v3, %v220_v20  ;;  %v2412_v23 = vmul.u32.u64.low %v2355_v41, %v217_v19  ;;  %v2413_v24 = vmul.u32.u64.high %v2355_v41, %v217_v19, %v2412_v23  ;;  %v213_v33 = vsel %vm207_vm9, %v210_v5, %v212_v17 }
 0x100   :  { %v2417_v26 = vmul.u32.u64.low %v2355_v41, %v221_v22  ;;  %v2418_v27 = vmul.u32.u64.high %v2355_v41, %v221_v22, %v2417_v26  ;;  %v2423_v30 = vshrl.u32 %v443_v21, 30  ;;  %v500_v34 = vand.u32 31, %v498_v29 }
 0x101   :  { %v232_v45 = vadd.s32 1, %v2413_v24  ;;  %v229_v51 = vmul.u32 %v2355_v41, %v213_v33  ;;  %v494_v53 = vor.u32 8388608, %v493_v28  ;;  %v147_v36 = vlaneseq }
 0x102   :  { %v445_v43 = vshll.u32 %v2423_v30, 30  ;;  %v501_v49 = vsub.s32 32, %v500_v34  ;;  %vm231_vm13 = vc.u32 %v2418_v27, %v2412_v23  ;;  %v2439_v58 = vadd.f32 %v2312_v6, %v2330_v14 }
 0x103   :  { %v233_v47 = vsel %vm231_vm13, %v232_v45, %v2413_v24  ;;  %v503_v59 = vshll.u32 %v2250_v44, %v500_v34  ;;  %v506_v60 = vshll.u32 %v3242_v48, %v500_v34  ;;  %v499_v0 = vshrl.u32 %v498_v29, 5 }
 0x104   :  { %v2432_v55 = vsub.s32 %v442_v4, %v445_v43  ;;  %v234_v56 = vadd.s32 %v233_v47, %v229_v51  ;;  %v504_v40 = vshrl.u32 %v3242_v48, %v501_v49  ;;  %v507_v57 = vshrl.u32 %v3238_v50, %v501_v49 }
 0x105   :  { %v510_v62 = vshrl.u32 %v3240_v52, %v501_v49  ;;  %v509_v1 = vshll.u32 %v3238_v50, %v500_v34  ;;  %v2446_v39 = vshll.u32 %v494_v53, 8  ;;  %v513_v4 = vshrl.u32 %v2254_v54, %v501_v49 }
 0x106   :  { %v448_v41 = vsub.s32 0, %v2432_v55  ;;  %v235_v63 = vadd.s32 536870912, %v234_v56  ;;  %v505_v46 = vor.u32 %v504_v40, %v503_v59  ;;  %v508_v3 = vor.u32 %v507_v57, %v506_v60 }
 0x107   :  { %v511_v13 = vor.u32 %v510_v62, %v509_v1  ;;  %v512_v16 = vshll.u32 %v3240_v52, %v500_v34  ;;  %v516_v17 = vshrl.u32 %v2255_v61, %v501_v49  ;;  %v438_v19 = vadd.s32 %v2386_v38, %v2383_v37 }
 0x108   :  { %v1799_v2 = vmin.u32 %v448_v41, %v2432_v55  ;;  %v2450_v5 = vshrl.u32 %v235_v63, 30  ;;  %v515_v21 = vshll.u32 %v2254_v54, %v500_v34  ;;  %v281_v22 = vand.u32 2139095040, %v2439_v58 }
 0x109   :  { %v502_v26 = vshrl.u32 %v2250_v44, %v501_v49  ;;  %v514_v28 = vor.u32 %v513_v4, %v512_v16  ;;  %vm518_vm14 = vcmp.lt.s32.totalorder %v499_v0, 1  ;;  %vm520_vm15 = vcmp.lt.s32.totalorder %v499_v0, 3 }
 0x10a   :  { %v450_v20 = vclz %v1799_v2  ;;  %v237_v24 = vshll.u32 %v2450_v5, 30  ;;  %v517_v33 = vor.u32 %v516_v17, %v515_v21  ;;  %vm521_vm0 = vcmp.lt.s32.totalorder %v499_v0, 4 }
 0x10b   :  { %v523_v45 = vsel %vm521_vm0, %v511_v13, 2102212464  ;;  %v526_v37 = vsel %vm518_vm14, %v505_v46, %v508_v3  ;;  %v527_v38 = vsel %vm521_vm0, %v514_v28, 920167782  ;;  %vm519_vm2 = vcmp.lt.s32.totalorder %v499_v0, 2 }
 0x10c   :  { %v1800_v29 = vadd.s32 4294967294, %v450_v20  ;;  %v2460_v43 = vsub.s32 %v234_v56, %v237_v24  ;;  %v522_v34 = vsel %vm518_vm14, %v502_v26, %v505_v46  ;;  %v528_v49 = vsel %vm520_vm15, %v511_v13, %v527_v38 }
 0x10d   :  { %v529_v47 = vsel %vm519_vm2, %v526_v37, %v528_v49  ;;  %v530_v56 = vsel %vm518_vm14, %v508_v3, %v511_v13  ;;  %v524_v41 = vsel %vm520_vm15, %v508_v3, %v523_v45  ;;  %v531_v59 = vsel %vm521_vm0, %v517_v33, 1326507024  ;;  %v146_v37 = vld [vmem:[%s3230_s2] sm:$0x3] }
 0x10e   :  { %vm1801_vm1 = vcmp.lt.s32.totalorder %v1800_v29, 0  ;;  %v240_v53 = vsub.s32 0, %v2460_v43  ;;  %v532_v62 = vsel %vm520_vm15, %v514_v28, %v531_v59  ;;  %v468_v16 = vsub.s32 4, %v2423_v30 }
 0x10f   :  { %v453_v51 = vsel %vm1801_vm1, 0, %v1800_v29  ;;  %v2475_v63 = vmul.u32.u64.low %v2446_v39, %v529_v47  ;;  %v2476_v1 = vmul.u32.u64.high %v2446_v39, %v529_v47, %v2475_v63  ;;  %v533_v13 = vsel %vm519_vm2, %v530_v56, %v532_v62 }
 0x110   :  { %v454_v40 = vsub.s32 32, %v453_v51  ;;  %v458_v57 = vsub.s32 4294967266, %v453_v51  ;;  %v1791_v60 = vmin.u32 %v240_v53, %v2460_v43  ;;  %v455_v2 = vshll.u32 %v2432_v55, %v453_v51 }
 0x111   :  { %v2483_v3 = vmul.u32.u64.low %v2446_v39, %v533_v13  ;;  %v2484_v17 = vmul.u32.u64.high %v2446_v39, %v533_v13, %v2483_v3  ;;  %v282_v20 = vshrl.u32 %v281_v22, 23  ;;  %v148_v21 = vshrl.u32 %v147_v36, 7 }
 0x112   :  { %v456_v46 = vshrl.u32 %v438_v19, %v454_v40  ;;  %v459_v4 = vadd.s32 127, %v458_v57  ;;  %v525_v28 = vsel %vm519_vm2, %v522_v34, %v524_v41  ;;  %v242_v29 = vclz %v1791_v60 }
 0x113   :  { %v544_v33 = vadd.s32 1, %v2476_v1  ;;  %v1794_v55 = vadd.s32 4294967169, %v282_v20  ;;  %vm384_vm3 = vcmp.lt.s32.totalorder %v2318_v8, 0  ;;  %v2491_v45 = vadd.f32 %v2343_v25, %v2312_v6 }
 0x114   :  { %v457_v24 = vor.u32 %v456_v46, %v455_v2  ;;  %v460_v26 = vshll.u32 %v459_v4, 23  ;;  %v469_v22 = vsel %vm384_vm3, %v468_v16, %v2423_v30  ;;  %v541_v36 = vmul.u32 %v2446_v39, %v525_v28 }
 0x115   :  { %vm543_vm4 = vc.u32 %v2484_v17, %v2475_v63  ;;  %v288_v0 = vadd.s32 1, %v1794_v55  ;;  %v149_v38 = vsub.s32 0, %v148_v21  ;;  %vm2505_vm5 = vcmp.le.f32.partialorder %v382_v12, 0.7853982 }
 0x116   :  { %v461_v19 = vor.u32 4788187, %v460_v26  ;;  %v464_v49 = vcvt.s32.f32 %v457_v24  ;;  %v545_v51 = vsel %vm543_vm4, %v544_v33, %v2476_v1  ;;  %v1792_v30 = vadd.s32 4294967294, %v242_v29 }
 0x117   :  { %v546_v39 = vadd.s32 %v545_v51, %v541_v36  ;;  %v3235_v47 = vand.u32 2147483647, %v2439_v58  ;;  %v471_v40 = vsel %vm2505_vm5, 0, %v469_v22  ;;  %vm289_vm6 = vcmp.gt.s32.totalorder %v288_v0, 0 }
 0x118   :  { %v462_v34 = vand.u32 2147483647, %v461_v19  ;;  %v290_v41 = vsel %vm289_vm6, %v288_v0, 0  ;;  %v801_v59 = vand.u32 2139095040, %v2491_v45  ;;  %v2513_v60 = vrot.slane %v146_v37, %v149_v38 }
 0x119   :  { %v547_v57 = vadd.s32 536870912, %v546_v39  ;;  %v1008_v12 = vsub.s32 1, %v148_v21  ;;  %v292_v1 = vand.u32 31, %v290_v41  ;;  %v475_v2 = vadd.s32 3, %v471_v40 }
 0x11a   :  { %v465_v56 = vmul.f32 %v464_v49, %v462_v34  ;;  %vm1793_vm7 = vcmp.lt.s32.totalorder %v1792_v30, 0  ;;  %v285_v4 = vand.u32 8388607, %v3235_v47  ;;  %v3234_v3 = vand.u32 2147483647, %v2491_v45 }
 0x11b   :  { %v2515_v46 = vshrl.u32 %v547_v57, 30  ;;  %v293_v16 = vsub.s32 32, %v292_v1  ;;  %v802_v24 = vshrl.u32 %v801_v59, 23  ;;  %v2528_v26 = vmul.f32 %v2314_v7, %v2513_v60 }
 0x11c   :  { %v466_v62 = vxor.u32 2147483648, %v465_v56  ;;  %v2530_v28 = vrot.slane %v146_v37, %v1008_v12  ;;  %v2532_v29 = vsel %vm1793_vm7, 0, %v1792_v30  ;;  %v476_v33 = vand.u32 3, %v475_v2 }
 0x11d   :  { %v549_v21 = vshll.u32 %v2515_v46, 30  ;;  %v286_v19 = vor.u32 8388608, %v285_v4  ;;  %v296_v22 = vshrl.u32 %v3242_v48, %v293_v16  ;;  %v299_v36 = vshrl.u32 %v3238_v50, %v293_v16 }
 0x11e   :  { %v467_v13 = vsel %vm384_vm3, %v466_v62, %v465_v56  ;;  %v302_v0 = vshrl.u32 %v3240_v52, %v293_v16  ;;  %v2541_v7 = vand.u32 8388607, %v3234_v3  ;;  %v250_v37 = vsub.s32 4294967266, %v2532_v29 }
 0x11f   :  { %v470_v20 = vsel %vm2505_vm5, %v2318_v8, %v467_v13  ;;  %v2534_v55 = vsub.s32 %v546_v39, %v549_v21  ;;  %v295_v34 = vshll.u32 %v2250_v44, %v292_v1  ;;  %v1814_v49 = vadd.s32 4294967169, %v802_v24 }
 0x120   :  { %2217 = vcosq.f32 %v470_v20  ;;  %v298_v51 = vshll.u32 %v3242_v48, %v292_v1  ;;  %v301_v53 = vshll.u32 %v3238_v50, %v292_v1  ;;  %v304_v30 = vshll.u32 %v3240_v52, %v292_v1 }
 0x121   :  { %2219 = vsinq.f32 %v470_v20  ;;  %v552_v38 = vsub.s32 0, %v2534_v55  ;;  %v305_v39 = vshrl.u32 %v2254_v54, %v293_v16  ;;  %vm478_vm8 = vcmp.eq.s32.totalorder %v476_v33, 0 }
 0x122   :  { %vm481_vm9 = vcmp.eq.s32.totalorder %v476_v33, 2  ;;  %v291_v40 = vshrl.u32 %v290_v41, 5  ;;  %v308_v57 = vshrl.u32 %v2255_v61, %v293_v16  ;;  %vm477_vm10 = vcmp.lt.s32.totalorder %v476_v33, 2 }
 0x123   :  { %v1803_v56 = vmin.u32 %v552_v38, %v2534_v55  ;;  %v297_v59 = vor.u32 %v296_v22, %v295_v34  ;;  %v300_v62 = vor.u32 %v299_v36, %v298_v51  ;;  %v303_v12 = vor.u32 %v302_v0, %v301_v53 }
 0x124   :  { %v306_v2 = vor.u32 %v305_v39, %v304_v30  ;;  %vm474_vm11 = vweird.f32 %v2318_v8  ;;  %v542_v4 = vadd.s32 %v2475_v63, %v2484_v17  ;;  %v307_v20 = vshll.u32 %v2254_v54, %v292_v1 }
 0x125   :  { %v554_v13 = vclz %v1803_v56  ;;  %v2556_v21 = vshll.u32 %v286_v19, 8  ;;  %v2558_v24 = vadd.s32 127, %v250_v37  ;;  %v294_v41 = vshrl.u32 %v2250_v44, %v293_v16 }
 0x126   :  { %v806_v38 = vor.u32 8388608, %v2541_v7  ;;  %v808_v22 = vadd.s32 1, %v1814_v49  ;;  %v309_v0 = vor.u32 %v308_v57, %v307_v20  ;;  %vm310_vm12 = vcmp.lt.s32.totalorder %v291_v40, 1 }
 0x127   :  { %v1804_v36 = vadd.s32 4294967294, %v554_v13  ;;  %vm313_vm13 = vcmp.lt.s32.totalorder %v291_v40, 4  ;;  %vm312_vm14 = vcmp.lt.s32.totalorder %v291_v40, 3  ;;  %v318_v17 = vsel %vm310_vm12, %v297_v59, %v300_v62 }
 0x128   :  { %v315_v63 = vsel %vm313_vm13, %v303_v12, 2102212464  ;;  %v319_v1 = vsel %vm313_vm13, %v306_v2, 920167782  ;;  %vm311_vm0 = vcmp.lt.s32.totalorder %v291_v40, 2  ;;  %v314_v51 = vsel %vm310_vm12, %v294_v41, %v297_v59 }
 0x129   :  { %vm1805_vm15 = vcmp.lt.s32.totalorder %v1804_v36, 0  ;;  %v320_v16 = vsel %vm312_vm14, %v303_v12, %v319_v1  ;;  %v316_v53 = vsel %vm312_vm14, %v300_v62, %v315_v63  ;;  %v322_v3 = vsel %vm310_vm12, %v300_v62, %v303_v12 }
 0x12a   :  { %v2218_v34 = vpop.eup %2217  ;;  %v557_v49 = vsel %vm1805_vm15, 0, %v1804_v36  ;;  %v321_v57 = vsel %vm311_vm0, %v318_v17, %v320_v16  ;;  %v323_v1 = vsel %vm313_vm13, %v309_v0, 1326507024  ;;  %vm809_vm1 = vcmp.gt.s32.totalorder %v808_v22, 0 }
 0x12b   :  { %v2220_v19 = vpop.eup %2219  ;;  %v482_v37 = vxor.u32 2147483648, %v2218_v34  ;;  %v558_v39 = vsub.s32 32, %v557_v49  ;;  %v562_v56 = vsub.s32 4294967266, %v557_v49  ;;  %v559_v20 = vshll.u32 %v2534_v55, %v557_v49 }
 0x12c   :  { %v479_v7 = vxor.u32 2147483648, %v2220_v19  ;;  %v324_v41 = vsel %vm312_vm14, %v306_v2, %v323_v1  ;;  %v246_v33 = vsub.s32 32, %v2532_v29  ;;  %v810_v8 = vsel %vm809_vm1, %v808_v22, 0 }
 0x12d   :  { %v483_v30 = vsel %vm481_vm9, %v482_v37, %v2220_v19  ;;  %v560_v47 = vshrl.u32 %v542_v4, %v558_v39  ;;  %v563_v59 = vadd.s32 127, %v562_v56  ;;  %v325_v19 = vsel %vm311_vm0, %v322_v3, %v324_v41 }
 0x12e   :  { %v480_v13 = vsel %vm478_vm8, %v2218_v34, %v479_v7  ;;  %v2580_v17 = vmul.u32.u64.low %v2556_v21, %v321_v57  ;;  %v2581_v34 = vmul.u32.u64.high %v2556_v21, %v321_v57, %v2580_v17  ;;  %v317_v37 = vsel %vm311_vm0, %v314_v51, %v316_v53 }
 0x12f   :  { %v484_v36 = vsel %vm477_vm10, %v480_v13, %v483_v30  ;;  %v561_v62 = vor.u32 %v560_v47, %v559_v20  ;;  %v564_v12 = vshll.u32 %v563_v59, 23  ;;  %v2594_v16 = vshrl.u32 %v810_v8, 5  ;;  %v2177_v47 = vld [vmem:[%s3231_s4] sm:$0xff]  }
 0x130   :  { %v485_v63 = vsel %vm474_vm11, nan, %v484_v36  ;;  %v2587_v4 = vmul.u32.u64.low %v2556_v21, %v325_v19  ;;  %v2588_v2 = vmul.u32.u64.high %v2556_v21, %v325_v19, %v2587_v4  ;;  %v230_v7 = vadd.s32 %v2412_v23, %v2418_v27  ;;  %2013 = vmatprep.subr.bf16.mxu1 %v2177_v47 }
 0x131   :  { %v1012_v55 = vmul.f32 %v2530_v28, %v485_v63  ;;  %v565_v3 = vor.u32 4788187, %v564_v12  ;;  %v247_v49 = vshll.u32 %v2460_v43, %v2532_v29  ;;  %v336_v22 = vadd.s32 1, %v2581_v34  ;;  %2014 = vmatpush3.bf16.msra.mxu1 %v2177_v47 }
 0x132   :  { %v812_v30 = vand.u32 31, %v810_v8  ;;  %vm488_vm2 = vcmp.lt.s32.totalorder %v2336_v18, 0  ;;  %v568_v51 = vcvt.s32.f32 %v561_v62  ;;  %v2606_v53 = vshll.u32 %v806_v38, 8  ;;  %v2178_v38 = vld [vmem:[%s3231_s4 + $0x8] sm:$0xff]  }
 0x133   :  { %v2591_v0 = vadd.f32 %v1012_v55, %v2528_v26  ;;  %v252_v26 = vshll.u32 %v2558_v24, 23  ;;  %v566_v40 = vand.u32 2147483647, %v565_v3  ;;  %v333_v39 = vmul.u32 %v2556_v21, %v317_v37  ;;  %2015 = vmatprep.subr.bf16.mxu1 %v2178_v38  ;;  %v2179_v37 = vld [vmem:[%s3231_s4 + $0x10] sm:$0xff]  }
 0x134   :  { %vm335_vm3 = vc.u32 %v2588_v2, %v2580_v17  ;;  %v813_v23 = vsub.s32 32, %v812_v30  ;;  %vm830_vm4 = vcmp.lt.s32.totalorder %v2594_v16, 1  ;;  %v815_v57 = vshll.u32 %v2250_v44, %v812_v30 }
 0x135   :  { %v569_v27 = vmul.f32 %v568_v51, %v566_v40  ;;  %v337_v56 = vsel %vm335_vm3, %v336_v22, %v2581_v34  ;;  %vm831_vm5 = vcmp.lt.s32.totalorder %v2594_v16, 2  ;;  %v818_v20 = vshll.u32 %v3242_v48, %v812_v30  ;;  %2016 = vmatpush3.bf16.msra.mxu1 %v2178_v38 }
 0x136   :  { %v338_v13 = vadd.s32 %v337_v56, %v333_v39  ;;  %v816_v21 = vshrl.u32 %v3242_v48, %v813_v23  ;;  %v819_v1 = vshrl.u32 %v3238_v50, %v813_v23  ;;  %vm2623_vm6 = vcmp.le.f32.partialorder %v486_v42, 0.7853982  ;;  %2017 = vmatprep.subr.bf16.mxu1 %v2179_v37 }
 0x137   :  { %v821_v59 = vshll.u32 %v3238_v50, %v812_v30  ;;  %v822_v41 = vshrl.u32 %v3240_v52, %v813_v23  ;;  %v824_v63 = vshll.u32 %v3240_v52, %v812_v30  ;;  %v825_v19 = vshrl.u32 %v2254_v54, %v813_v23 }
 0x138   :  { %v570_v34 = vxor.u32 2147483648, %v569_v27  ;;  %v339_v55 = vadd.s32 536870912, %v338_v13  ;;  %v817_v62 = vor.u32 %v816_v21, %v815_v57  ;;  %v820_v12 = vor.u32 %v819_v1, %v818_v20  ;;  %v2180_v1 = vld [vmem:[%s3231_s4 + $0x18] sm:$0xff]  }
 0x139   :  { %v823_v4 = vor.u32 %v822_v41, %v821_v59  ;;  %v826_v8 = vor.u32 %v825_v19, %v824_v63  ;;  %v827_v42 = vshll.u32 %v2254_v54, %v812_v30  ;;  %v828_v3 = vshrl.u32 %v2255_v61, %v813_v23  ;;  %2018 = vmatpush3.bf16.msra.mxu1 %v2179_v37 }
 0x13a   :  { %v248_v47 = vshrl.u32 %v230_v7, %v246_v33  ;;  %v2636_v22 = vshrl.u32 %v339_v55, 30  ;;  %vm833_vm7 = vcmp.lt.s32.totalorder %v2594_v16, 4  ;;  %v2641_v40 = vadd.f32 %v2312_v6, %v2345_v31  ;;  %2019 = vmatprep.subr.bf16.mxu1 %v2180_v1 }
 0x13b   :  { %v814_v51 = vshrl.u32 %v2250_v44, %v813_v23  ;;  %v829_v39 = vor.u32 %v828_v3, %v827_v42  ;;  %v835_v56 = vsel %vm833_vm7, %v823_v4, 2102212464  ;;  %v838_v30 = vsel %vm830_vm4, %v817_v62, %v820_v12 }
 0x13c   :  { %v571_v57 = vsel %vm488_vm2, %v570_v34, %v569_v27  ;;  %v341_v33 = vshll.u32 %v2636_v22, 30  ;;  %vm832_vm8 = vcmp.lt.s32.totalorder %v2594_v16, 3  ;;  %v839_v7 = vsel %vm833_vm7, %v826_v8, 920167782 }
 0x13d   :  { %v834_v38 = vsel %vm830_vm4, %v814_v51, %v817_v62  ;;  %v840_v21 = vsel %vm832_vm8, %v823_v4, %v839_v7  ;;  %v842_v23 = vsel %vm830_vm4, %v820_v12, %v823_v4  ;;  %v843_v20 = vsel %vm833_vm7, %v829_v39, 1326507024  ;;  %2020 = vmatpush3.bf16.msra.mxu1 %v2180_v1  ;;  %v2181_v51 = vld [vmem:[%s3231_s4 + $0x20] sm:$0xff]  }
 0x13e   :  { %v2657_v59 = vsub.s32 %v338_v13, %v341_v33  ;;  %v836_v27 = vsel %vm832_vm8, %v820_v12, %v835_v56  ;;  %v841_v41 = vsel %vm831_vm5, %v838_v30, %v840_v21  ;;  %v844_v63 = vsel %vm832_vm8, %v826_v8, %v843_v20  ;;  %2021 = vmatprep.subr.bf16.mxu1 %v2181_v51 }
 0x13f   :  { %v572_v19 = vsub.s32 4, %v2515_v46  ;;  %v845_v34 = vsel %vm831_vm5, %v842_v23, %v844_v63  ;;  %v2665_v55 = vmul.u32.u64.low %v2606_v53, %v841_v41  ;;  %v2666_v62 = vmul.u32.u64.high %v2606_v53, %v841_v41, %v2665_v55 }
 0x140   :  { %v2672_v13 = vsel %vm2623_vm6, %v2336_v18, %v571_v57  ;;  %v344_v12 = vsub.s32 0, %v2657_v59  ;;  %v2676_v4 = vmul.u32.u64.low %v2606_v53, %v845_v34  ;;  %v2677_v8 = vmul.u32.u64.high %v2606_v53, %v845_v34, %v2676_v4 }
 0x141   :  { %v253_v42 = vor.u32 4788187, %v252_v26  ;;  %v837_v3 = vsel %vm831_vm5, %v834_v38, %v836_v27  ;;  %v593_v37 = vand.u32 2139095040, %v2641_v40  ;;  %v249_v39 = vor.u32 %v248_v47, %v247_v49  ;;  %2022 = vmatpush3.bf16.msra.mxu1 %v2181_v51  ;;  %v2182_v49 = vld [vmem:[%s3231_s4 + $0x28] sm:$0xff]   ;;  %v2183_v27 = vld [vmem:[%s3231_s4 + $0x30] sm:$0xff]  }
 0x142   :  { %v1795_v56 = vmin.u32 %v344_v12, %v2657_v59  ;;  %2221 = vcosq.f32 %v2672_v13  ;;  %v856_v24 = vadd.s32 1, %v2666_v62  ;;  %v3236_v26 = vand.u32 2147483647, %v2641_v40  ;;  %2023 = vmatprep.subr.bf16.mxu1 %v2182_v49 }
 0x143   :  { %v594_v16 = vshrl.u32 %v593_v37, 23  ;;  %v573_v30 = vsel %vm488_vm2, %v572_v19, %v2515_v46  ;;  %v853_v33 = vmul.u32 %v2606_v53, %v837_v3  ;;  %vm855_vm9 = vc.u32 %v2677_v8, %v2665_v55 }
 0x144   :  { %v346_v57 = vclz %v1795_v56  ;;  %v857_v43 = vsel %vm855_vm9, %v856_v24, %v2666_v62  ;;  %v254_v47 = vand.u32 2147483647, %v253_v42  ;;  %v575_v46 = vsel %vm2623_vm6, 0, %v573_v30 }
 0x145   :  { %v1806_v29 = vadd.s32 4294967169, %v594_v16  ;;  %v858_v38 = vadd.s32 %v857_v43, %v853_v33  ;;  %v597_v53 = vand.u32 8388607, %v3236_v26  ;;  %v256_v23 = vcvt.s32.f32 %v249_v39  ;;  %2024 = vmatpush3.bf16.msra.mxu1 %v2182_v49  ;;  %v2185_v43 = vld [vmem:[%s3231_s4 + $0x40] sm:$0xff]  }
 0x146   :  { %v1796_v7 = vadd.s32 4294967294, %v346_v57  ;;  %v2710_v1 = vadd.f32 %v2347_v32, %v2312_v6  ;;  %v579_v63 = vadd.s32 3, %v575_v46  ;;  %2025 = vmatprep.subr.bf16.mxu1 %v2183_v27  ;;  %v2184_v6 = vld [vmem:[%s3231_s4 + $0x38] sm:$0xff]   ;;  %vm176_vm12 = vcmp.lt.s32.totalorder %v2324_v10, 0  ;;  %2037 = vmatprep.subr.bf16.mxu0 %v2185_v43 }
 0x147   :  { %v600_v21 = vadd.s32 1, %v1806_v29  ;;  %v859_v20 = vadd.s32 536870912, %v858_v38  ;;  %v257_v36 = vmul.f32 %v256_v23, %v254_v47  ;;  %v598_v34 = vor.u32 8388608, %v597_v53  ;;  %v2186_v29 = vld [vmem:[%s3231_s4 + $0x48] sm:$0xff]   ;;  %2038 = vmatpush3.bf16.msra.mxu0 %v2185_v43 }
 0x148   :  { %vm1797_vm10 = vcmp.lt.s32.totalorder %v1796_v7, 0  ;;  %v3237_v12 = vand.u32 2147483647, %v2710_v1  ;;  %v905_v51 = vand.u32 2139095040, %v2710_v1  ;;  %v2729_v56 = vand.u32 3, %v579_v63  ;;  %2039 = vmatprep.subr.bf16.mxu0 %v2186_v29 }
 0x149   :  { %vm601_vm11 = vcmp.gt.s32.totalorder %v600_v21, 0  ;;  %v2715_v41 = vsel %vm1797_vm10, 0, %v1796_v7  ;;  %v2717_v19 = vshrl.u32 %v859_v20, 30  ;;  %2026 = vmatpush3.bf16.msra.mxu1 %v2183_v27  ;;  %v258_v39 = vxor.u32 2147483648, %v257_v36 }
 0x14a   :  { %v602_v62 = vsel %vm601_vm11, %v600_v21, 0  ;;  %v354_v42 = vsub.s32 4294967266, %v2715_v41  ;;  %2027 = vmatprep.subr.bf16.mxu1 %v2184_v6  ;;  %v2734_v57 = vshll.u32 %v598_v34, 8  ;;  %v2738_v33 = vand.u32 8388607, %v3237_v12  ;;  %v2187_v34 = vld [vmem:[%s3231_s4 + $0x50] sm:$0xff]  }
 0x14b   :  { %v861_v3 = vshll.u32 %v2717_v19, 30  ;;  %v604_v37 = vand.u32 31, %v602_v62  ;;  %v350_v46 = vsub.s32 32, %v2715_v41  ;;  %2223 = vsinq.f32 %v2672_v13  ;;  %2040 = vmatpush3.bf16.msra.mxu0 %v2186_v29 }
 0x14c   :  { %v2723_v4 = vpop.eup %2221  ;;  %v2746_v49 = vadd.s32 127, %v354_v42  ;;  %v2756_v27 = vshrl.u32 %v602_v62, 5  ;;  %vm2768_vm13 = vcmp.le.f32.partialorder %v174_v15, 0.7853982  ;;  %v259_v15 = vsel %vm176_vm12, %v258_v39, %v257_v36  ;;  %2041 = vmatprep.subr.bf16.mxu0 %v2187_v34  ;;  %v2189_v36 = vld [vmem:[%s3231_s4 + $0x60] sm:$0xff]  }
 0x14d   :  { %v2731_v24 = vsub.s32 %v858_v38, %v861_v3  ;;  %v605_v16 = vsub.s32 32, %v604_v37  ;;  %v586_v30 = vxor.u32 2147483648, %v2723_v4  ;;  %2028 = vmatpush3.bf16.msra.mxu1 %v2184_v6  ;;  %v906_v38 = vshrl.u32 %v905_v51, 23 }
 0x14e   :  { %v613_v21 = vshll.u32 %v3238_v50, %v604_v37  ;;  %v607_v63 = vshll.u32 %v2250_v44, %v604_v37  ;;  %v610_v6 = vshll.u32 %v3242_v48, %v604_v37  ;;  %v616_v3 = vshll.u32 %v3240_v52, %v604_v37 }
 0x14f   :  { %v864_v47 = vsub.s32 0, %v2731_v24  ;;  %v608_v7 = vshrl.u32 %v3242_v48, %v605_v16  ;;  %v611_v53 = vshrl.u32 %v3238_v50, %v605_v16  ;;  %v614_v23 = vshrl.u32 %v3240_v52, %v605_v16  ;;  %2042 = vmatpush3.bf16.msra.mxu0 %v2187_v34 }
 0x150   :  { %v617_v51 = vshrl.u32 %v2254_v54, %v605_v16  ;;  %v356_v13 = vshll.u32 %v2746_v49, 23  ;;  %v1818_v26 = vadd.s32 4294967169, %v906_v38  ;;  %vm622_vm14 = vcmp.lt.s32.totalorder %v2756_v27, 1  ;;  %v2188_v49 = vld [vmem:[%s3231_s4 + $0x58] sm:$0xff]  }
 0x151   :  { %v1815_v20 = vmin.u32 %v864_v47, %v2731_v24  ;;  %v615_v42 = vor.u32 %v614_v23, %v613_v21  ;;  %v609_v62 = vor.u32 %v608_v7, %v607_v63  ;;  %v612_v12 = vor.u32 %v611_v53, %v610_v6  ;;  %2043 = vmatprep.subr.bf16.mxu0 %v2188_v49 }
 0x152   :  { %v618_v50 = vor.u32 %v617_v51, %v616_v3  ;;  %v619_v21 = vshll.u32 %v2254_v54, %v604_v37  ;;  %v620_v23 = vshrl.u32 %v2255_v61, %v605_v16  ;;  %vm625_vm15 = vcmp.lt.s32.totalorder %v2756_v27, 4 }
 0x153   :  { %v866_v47 = vclz %v1815_v20  ;;  %v334_v7 = vadd.s32 %v2580_v17, %v2588_v2  ;;  %v627_v37 = vsel %vm625_vm15, %v615_v42, 2102212464  ;;  %vm585_vm0 = vcmp.eq.s32.totalorder %v2729_v56, 2  ;;  %2044 = vmatpush3.bf16.msra.mxu0 %v2188_v49  ;;  %v2249_v49 = vld [vmem:[%s3229_s3] ss:$0 sm:$0xff] }
 0x154   :  { %v621_v38 = vor.u32 %v620_v23, %v619_v21  ;;  %v854_v29 = vadd.s32 %v2665_v55, %v2677_v8  ;;  %v606_v53 = vshrl.u32 %v2250_v44, %v605_v16  ;;  %vm623_vm2 = vcmp.lt.s32.totalorder %v2756_v27, 2  ;;  %2045 = vmatprep.subr.bf16.mxu0 %v2189_v36 }
 0x155   :  { %v1816_v52 = vadd.s32 4294967294, %v866_v47  ;;  %vm624_vm3 = vcmp.lt.s32.totalorder %v2756_v27, 3  ;;  %v630_v17 = vsel %vm622_vm14, %v609_v62, %v612_v12  ;;  %v631_v2 = vsel %vm625_vm15, %v618_v50, 920167782  ;;  %v2808_v51 = vpop.eup %2223 }
 0x156   :  { %v351_v55 = vshll.u32 %v2657_v59, %v2715_v41  ;;  %v352_v8 = vshrl.u32 %v334_v7, %v350_v46  ;;  %v632_v63 = vsel %vm624_vm3, %v615_v42, %v631_v2  ;;  %v634_v6 = vsel %vm622_vm14, %v612_v12, %v615_v42 }
 0x157   :  { %vm1817_vm1 = vcmp.lt.s32.totalorder %v1816_v52, 0  ;;  %v635_v3 = vsel %vm625_vm15, %v621_v38, 1326507024  ;;  %v628_v41 = vsel %vm624_vm3, %v612_v12, %v627_v37  ;;  %v633_v46 = vsel %vm623_vm2, %v630_v17, %v632_v63  ;;  %2046 = vmatpush3.bf16.msra.mxu0 %v2189_v36 }
 0x158   :  { %v869_v20 = vsel %vm1817_vm1, 0, %v1816_v52  ;;  %v626_v52 = vsel %vm622_vm14, %v606_v53, %v609_v62  ;;  %v636_v34 = vsel %vm624_vm3, %v618_v50, %v635_v3  ;;  %v912_v21 = vadd.s32 1, %v1818_v26  ;;  %v2190_v26 = vld [vmem:[%s3231_s4 + $0x68] sm:$0xff]  }
 0x159   :  { %v870_v39 = vsub.s32 32, %v869_v20  ;;  %v874_v16 = vsub.s32 4294967266, %v869_v20  ;;  %v637_v47 = vsel %vm623_vm2, %v634_v6, %v636_v34  ;;  %v2826_v23 = vsel %vm2768_vm13, %v2324_v10, %v259_v15  ;;  %2047 = vmatprep.subr.bf16.mxu0 %v2190_v26 }
 0x15a   :  { %v2819_v42 = vmul.u32.u64.low %v2734_v57, %v633_v46  ;;  %v2820_v62 = vmul.u32.u64.high %v2734_v57, %v633_v46, %v2819_v42  ;;  %v357_v12 = vor.u32 4788187, %v356_v13  ;;  %v353_v50 = vor.u32 %v352_v8, %v351_v55 }
 0x15b   :  { %v875_v59 = vadd.s32 127, %v874_v16  ;;  %v2829_v7 = vmul.u32.u64.low %v2734_v57, %v637_v47  ;;  %v2830_v38 = vmul.u32.u64.high %v2734_v57, %v637_v47, %v2829_v7  ;;  %v872_v37 = vshrl.u32 %v854_v29, %v870_v39  ;;  %2048 = vmatpush3.bf16.msra.mxu0 %v2190_v26 }
 0x15c   :  { %v629_v53 = vsel %vm623_vm2, %v626_v52, %v628_v41  ;;  %vm913_vm4 = vcmp.gt.s32.totalorder %v912_v21, 0  ;;  %vm582_vm5 = vcmp.eq.s32.totalorder %v2729_v56, 0  ;;  %v583_v13 = vxor.u32 2147483648, %v2808_v51 }
 0x15d   :  { %v876_v15 = vshll.u32 %v875_v59, 23  ;;  %v914_v17 = vsel %vm913_vm4, %v912_v21, 0  ;;  %v2843_v29 = vadd.f32 %v2249_v49, %v2349_v35  ;;  %v2850_v27 = vsel %vm585_vm0, %v586_v30, %v2808_v51 }
 0x15e   :  { %v871_v2 = vshll.u32 %v2731_v24, %v869_v20  ;;  %v648_v55 = vadd.s32 1, %v2820_v62  ;;  %v916_v8 = vand.u32 31, %v914_v17  ;;  %v358_v39 = vand.u32 2147483647, %v357_v12 }
 0x15f   :  { %v645_v16 = vmul.u32 %v2734_v57, %v629_v53  ;;  %vm647_vm6 = vc.u32 %v2830_v38, %v2819_v42  ;;  %v910_v52 = vor.u32 8388608, %v2738_v33  ;;  %v360_v63 = vcvt.s32.f32 %v353_v50 }
 0x160   :  { %v873_v6 = vor.u32 %v872_v37, %v871_v2  ;;  %v649_v3 = vsel %vm647_vm6, %v648_v55, %v2820_v62  ;;  %v917_v30 = vsub.s32 32, %v916_v8  ;;  %v877_v51 = vor.u32 4788187, %v876_v15 }
 0x161   :  { %v650_v24 = vadd.s32 %v649_v3, %v645_v16  ;;  %v915_v20 = vshrl.u32 %v914_v17, 5  ;;  %v919_v59 = vshll.u32 %v2250_v44, %v916_v8  ;;  %v922_v57 = vshll.u32 %v3242_v48, %v916_v8 }
 0x162   :  { %v920_v41 = vshrl.u32 %v3242_v48, %v917_v30  ;;  %v3250_v46 = vmov 2131351028   ;;  %v3251_v47 = vmov 2102212464   ;;  %v929_v12 = vshrl.u32 %v2254_v54, %v917_v30 }
 0x163   :  { %v923_v34 = vshrl.u32 %v3250_v46, %v917_v30  ;;  %v926_v33 = vshrl.u32 %v3251_v47, %v917_v30  ;;  %v651_v36 = vadd.s32 536870912, %v650_v24  ;;  %v925_v21 = vshll.u32 %v3250_v46, %v916_v8 }
 0x164   :  { %v928_v62 = vshll.u32 %v3251_v47, %v916_v8  ;;  %v921_v7 = vor.u32 %v920_v41, %v919_v59  ;;  %v932_v37 = vshrl.u32 %v2255_v61, %v917_v30  ;;  %v697_v53 = vand.u32 2139095040, %v2843_v29 }
 0x165   :  { %v924_v50 = vor.u32 %v923_v34, %v922_v57  ;;  %v2869_v15 = vshrl.u32 %v651_v36, 30  ;;  %v927_v17 = vor.u32 %v926_v33, %v925_v21  ;;  %v931_v2 = vshll.u32 %v2254_v54, %v916_v8 }
 0x166   :  { %v930_v49 = vor.u32 %v929_v12, %v928_v62  ;;  %v584_v55 = vsel %vm582_vm5, %v2723_v4, %v583_v13  ;;  %v361_v16 = vmul.f32 %v360_v63, %v358_v39  ;;  %v878_v3 = vand.u32 2147483647, %v877_v51 }
 0x167   :  { %v950_v48 = vshll.u32 %v910_v52, 8  ;;  %v880_v26 = vcvt.s32.f32 %v873_v6  ;;  %v653_v59 = vshll.u32 %v2869_v15, 30  ;;  %v933_v41 = vor.u32 %v932_v37, %v931_v2 }
 0x168   :  { %vm934_vm7 = vcmp.lt.s32.totalorder %v915_v20, 1  ;;  %v918_v57 = vshrl.u32 %v2250_v44, %v917_v30  ;;  %vm937_vm8 = vcmp.lt.s32.totalorder %v915_v20, 4  ;;  %v698_v33 = vshrl.u32 %v697_v53, 23 }
 0x169   :  { %v942_v34 = vsel %vm934_vm7, %v921_v7, %v924_v50  ;;  %v2877_v36 = vsub.s32 %v650_v24, %v653_v59  ;;  %vm936_vm9 = vcmp.lt.s32.totalorder %v915_v20, 3  ;;  %v939_v8 = vsel %vm937_vm8, %v927_v17, 2102212464 }
 0x16a   :  { %v943_v21 = vsel %vm937_vm8, %v930_v49, 920167782  ;;  %v881_v62 = vmul.f32 %v880_v26, %v878_v3  ;;  %vm935_vm10 = vcmp.lt.s32.totalorder %v915_v20, 2  ;;  %v946_v13 = vsel %vm934_vm7, %v924_v50, %v927_v17 }
 0x16b   :  { %v944_v4 = vsel %vm936_vm9, %v927_v17, %v943_v21  ;;  %v656_v39 = vsub.s32 0, %v2877_v36  ;;  %v938_v52 = vsel %vm934_vm7, %v918_v57, %v921_v7  ;;  %v947_v6 = vsel %vm937_vm8, %v933_v41, 1326507024 }
 0x16c   :  { %v945_v63 = vsel %vm935_vm10, %v942_v34, %v944_v4  ;;  %v940_v51 = vsel %vm936_vm9, %v924_v50, %v939_v8  ;;  %v948_v30 = vsel %vm936_vm9, %v930_v49, %v947_v6  ;;  %vm581_vm11 = vcmp.lt.s32.totalorder %v2729_v56, 2 }
 0x16d   :  { %v2881_v12 = vmul.u32.u64.low %v950_v48, %v945_v63  ;;  %v2882_v37 = vmul.u32.u64.high %v950_v48, %v945_v63, %v2881_v12  ;;  %v362_v24 = vxor.u32 2147483648, %v361_v16  ;;  %v949_v53 = vsel %vm935_vm10, %v946_v13, %v948_v30 }
 0x16e   :  { %v1810_v2 = vadd.s32 4294967169, %v698_v33  ;;  %v588_v17 = vsel %vm581_vm11, %v584_v55, %v2850_v27  ;;  %v1807_v3 = vmin.u32 %v656_v39, %v2877_v36  ;;  %vm578_vm14 = vweird.f32 %v2336_v18 }
 0x16f   :  { %v2889_v7 = vmul.u32.u64.low %v950_v48, %v949_v53  ;;  %v2890_v26 = vmul.u32.u64.high %v950_v48, %v949_v53, %v2889_v7  ;;  %v884_v50 = vsub.s32 4, %v2717_v19  ;;  %v941_v49 = vsel %vm935_vm10, %v938_v52, %v940_v51 }
 0x170   :  { %vm280_vm15 = vcmp.lt.s32.totalorder %v2439_v58, 0  ;;  %v882_v56 = vxor.u32 2147483648, %v881_v62  ;;  %v960_v59 = vadd.s32 1, %v2882_v37  ;;  %v704_v41 = vadd.s32 1, %v1810_v2 }
 0x171   :  { %2225 = vsinq.f32 %v2826_v23  ;;  %v589_v27 = vsel %vm578_vm14, nan, %v588_v17  ;;  %v363_v55 = vsel %vm280_vm15, %v362_v24, %v361_v16  ;;  %vm800_vm0 = vcmp.lt.s32.totalorder %v2491_v45, 0 }
 0x172   :  { %v658_v57 = vclz %v1807_v3  ;;  %v957_v18 = vmul.u32 %v950_v48, %v941_v49  ;;  %vm959_vm1 = vc.u32 %v2890_v26, %v2881_v12  ;;  %vm705_vm2 = vcmp.gt.s32.totalorder %v704_v41, 0 }
 0x173   :  { %v885_v20 = vsel %vm800_vm0, %v884_v50, %v2717_v19  ;;  %v961_v34 = vsel %vm959_vm1, %v960_v59, %v2882_v37  ;;  %v694_v33 = vand.u32 2147483647, %v2843_v29  ;;  %v706_v8 = vsel %vm705_vm2, %v704_v41, 0 }
 0x174   :  { %2227 = vcosq.f32 %v2826_v23  ;;  %v3252_v21 = vand.u32 2147483647, %v2439_v58  ;;  %v883_v48 = vsel %vm800_vm0, %v882_v56, %v881_v62  ;;  %v962_v4 = vadd.s32 %v961_v34, %v957_v18 }
 0x175   :  { %v1013_v13 = vmul.f32 %v2530_v28, %v589_v27  ;;  %v3255_v39 = vand.u32 2147483647, %v2491_v45  ;;  %v1808_v63 = vadd.s32 4294967294, %v658_v57  ;;  %v708_v6 = vand.u32 31, %v706_v8 }
 0x176   :  { %vm2909_vm3 = vcmp.le.f32.partialorder %v3252_v21, 0.7853982  ;;  %v963_v23 = vadd.s32 536870912, %v962_v4  ;;  %v154_v51 = vmul.f32 %v2326_v11, %v2513_v60  ;;  %v2924_v62 = vand.u32 8388607, %v694_v33 }
 0x177   :  { %v366_v19 = vsel %vm2909_vm3, %v2439_v58, %v363_v55  ;;  %vm799_vm4 = vcmp.le.f32.partialorder %v3255_v39, 0.7853982  ;;  %v709_v24 = vsub.s32 32, %v708_v6  ;;  %v2930_v53 = vmul.f32 %v2513_v60, %v2320_v9 }
 0x178   :  { %v887_v52 = vsel %vm799_vm4, 0, %v885_v20  ;;  %v886_v30 = vsel %vm799_vm4, %v2491_v45, %v883_v48  ;;  %2229 = vcosq.f32 %v366_v19  ;;  %v2926_v37 = vshrl.u32 %v963_v23, 30 }
 0x179   :  { %v2932_v2 = vadd.f32 %v1013_v13, %v154_v51  ;;  %2231 = vsinq.f32 %v366_v19  ;;  %v2934_v17 = vadd.s32 3, %v887_v52  ;;  %v2938_v11 = vadd.s32 %v2819_v42, %v2830_v38 }
 0x17a   :  { %2233 = vcosq.f32 %v886_v30  ;;  %vm1809_vm5 = vcmp.lt.s32.totalorder %v1808_v63, 0  ;;  %v965_v3 = vshll.u32 %v2926_v37, 30  ;;  %v702_v50 = vor.u32 8388608, %v2924_v62 }
 0x17b   :  { %v2941_v7 = vpop.eup %2225  ;;  %2235 = vsinq.f32 %v886_v30  ;;  %v3256_v9 = vmov 2475754826   ;;  %v715_v56 = vshrl.u32 %v3250_v46, %v709_v24  ;;  %v717_v41 = vshll.u32 %v3250_v46, %v708_v6 }
 0x17c   :  { %v712_v49 = vshrl.u32 %v3256_v9, %v709_v24  ;;  %v2946_v59 = vsub.s32 %v962_v4, %v965_v3  ;;  %v718_v27 = vshrl.u32 %v3251_v47, %v709_v24  ;;  %v260_v42 = vsub.s32 4, %v2450_v5 }
 0x17d   :  { %v2951_v38 = vsel %vm1809_vm5, 0, %v1808_v63  ;;  %v707_v55 = vshrl.u32 %v706_v8, 5  ;;  %v711_v57 = vshll.u32 %v2250_v44, %v708_v6  ;;  %v714_v18 = vshll.u32 %v3256_v9, %v708_v6 }
 0x17e   :  { %v2955_v20 = vpop.eup %2227  ;;  %v968_v34 = vsub.s32 0, %v2946_v59  ;;  %v719_v21 = vor.u32 %v718_v27, %v717_v41  ;;  %v720_v48 = vshll.u32 %v3251_v47, %v708_v6  ;;  %v721_v46 = vshrl.u32 %v2254_v54, %v709_v24 }
 0x17f   :  { %v713_v4 = vor.u32 %v712_v49, %v711_v57  ;;  %v716_v13 = vor.u32 %v715_v56, %v714_v18  ;;  %v723_v19 = vshll.u32 %v2254_v54, %v708_v6  ;;  %v724_v39 = vshrl.u32 %v2255_v61, %v709_v24 }
 0x180   :  { %v666_v8 = vsub.s32 4294967266, %v2951_v38  ;;  %v1819_v52 = vmin.u32 %v968_v34, %v2946_v59  ;;  %v722_v63 = vor.u32 %v721_v46, %v720_v48  ;;  %v271_v23 = vxor.u32 2147483648, %v2941_v7 }
 0x181   :  { %v958_v51 = vadd.s32 %v2881_v12, %v2890_v26  ;;  %v725_v30 = vor.u32 %v724_v39, %v723_v19  ;;  %vm729_vm6 = vcmp.lt.s32.totalorder %v707_v55, 4  ;;  %v274_v47 = vxor.u32 2147483648, %v2955_v20 }
 0x182   :  { %v2968_v62 = vpop.eup %2229  ;;  %v662_v54 = vsub.s32 32, %v2951_v38  ;;  %v970_v6 = vclz %v1819_v52  ;;  %vm726_vm7 = vcmp.lt.s32.totalorder %v707_v55, 1  ;;  %v731_v61 = vsel %vm729_vm6, %v719_v21, 2102212464 }
 0x183   :  { %v2972_v3 = vpop.eup %2231  ;;  %v710_v9 = vshrl.u32 %v2250_v44, %v709_v24  ;;  %vm728_vm8 = vcmp.lt.s32.totalorder %v707_v55, 3  ;;  %v734_v49 = vsel %vm726_vm7, %v713_v4, %v716_v13  ;;  %v735_v12 = vsel %vm729_vm6, %v722_v63, 920167782 }
 0x184   :  { %v2976_v26 = vpop.eup %2233  ;;  %v667_v56 = vadd.s32 127, %v666_v8  ;;  %v1820_v41 = vadd.s32 4294967294, %v970_v6  ;;  %vm727_vm9 = vcmp.lt.s32.totalorder %v707_v55, 2  ;;  %v736_v27 = vsel %vm728_vm8, %v719_v21, %v735_v12 }
 0x185   :  { %v2978_v57 = vpop.eup %2235  ;;  %v730_v18 = vsel %vm726_vm7, %v710_v9, %v713_v4  ;;  %v732_v34 = vsel %vm728_vm8, %v716_v13, %v731_v61  ;;  %v738_v48 = vsel %vm726_vm7, %v716_v13, %v719_v21  ;;  %v739_v46 = vsel %vm729_vm6, %v725_v30, 1326507024 }
 0x186   :  { %vm1821_vm10 = vcmp.lt.s32.totalorder %v1820_v41, 0  ;;  %v737_v44 = vsel %vm727_vm9, %v734_v49, %v736_v27  ;;  %v740_v24 = vsel %vm728_vm8, %v722_v63, %v739_v46  ;;  %v742_v19 = vshll.u32 %v702_v50, 8 }
 0x187   :  { %v973_v39 = vsel %vm1821_vm10, 0, %v1820_v41  ;;  %v741_v52 = vsel %vm727_vm9, %v738_v48, %v740_v24  ;;  %v261_v8 = vsel %vm176_vm12, %v260_v42, %v2450_v5  ;;  %v364_v6 = vsub.s32 4, %v2636_v22 }
 0x188   :  { %v974_v12 = vsub.s32 32, %v973_v39  ;;  %v975_v4 = vshll.u32 %v2946_v59, %v973_v39  ;;  %v978_v21 = vsub.s32 4294967266, %v973_v39  ;;  %v733_v13 = vsel %vm727_vm9, %v730_v18, %v732_v34 }
 0x189   :  { %v2989_v30 = vmul.u32.u64.low %v742_v19, %v741_v52  ;;  %v2990_v61 = vmul.u32.u64.high %v742_v19, %v741_v52, %v2989_v30  ;;  %v2992_v63 = vmul.u32.u64.low %v742_v19, %v737_v44  ;;  %v2993_v50 = vmul.u32.u64.high %v742_v19, %v737_v44, %v2992_v63 }
 0x18a   :  { %v976_v9 = vshrl.u32 %v958_v51, %v974_v12  ;;  %v979_v49 = vadd.s32 127, %v978_v21  ;;  %v263_v5 = vsel %vm2768_vm13, 0, %v261_v8  ;;  %v365_v42 = vsel %vm280_vm15, %v364_v6, %v2636_v22 }
 0x18b   :  { %v663_v59 = vshll.u32 %v2877_v36, %v2951_v38  ;;  %v664_v55 = vshrl.u32 %v2938_v11, %v662_v54  ;;  %vm266_vm12 = vweird.f32 %v2324_v10  ;;  %v267_v41 = vadd.s32 3, %v263_v5 }
 0x18c   :  { %v367_v27 = vsel %vm2909_vm3, 0, %v365_v42  ;;  %v668_v51 = vshll.u32 %v667_v56, 23  ;;  %vm904_vm11 = vcmp.lt.s32.totalorder %v2710_v1, 0  ;;  %v977_v43 = vor.u32 %v976_v9, %v975_v4 }
 0x18d   :  { %v980_v18 = vshll.u32 %v979_v49, 23  ;;  %v371_v34 = vadd.s32 3, %v367_v27  ;;  %v749_v48 = vmul.u32 %v742_v19, %v733_v13  ;;  %vm751_vm13 = vc.u32 %v2990_v61, %v2992_v63 }
 0x18e   :  { %v752_v22 = vadd.s32 1, %v2993_v50  ;;  %v268_v36 = vand.u32 3, %v267_v41  ;;  %v375_v54 = vxor.u32 2147483648, %v2972_v3  ;;  %v1044_v16 = vpack.c.bf16 %v2932_v2, %v2591_v0 }
 0x18f   :  { %v981_v11 = vor.u32 4788187, %v980_v18  ;;  %v372_v38 = vand.u32 3, %v371_v34  ;;  %v984_v56 = vcvt.s32.f32 %v977_v43  ;;  %v378_v44 = vxor.u32 2147483648, %v2968_v62 }
 0x190   :  { %v753_v46 = vsel %vm751_vm13, %v752_v22, %v2993_v50  ;;  %vm270_vm14 = vcmp.eq.s32.totalorder %v268_v36, 0  ;;  %vm273_vm15 = vcmp.eq.s32.totalorder %v268_v36, 2  ;;  %v669_v52 = vor.u32 4788187, %v668_v51 }
 0x191   :  { %v982_v24 = vand.u32 2147483647, %v981_v11  ;;  %v754_v19 = vadd.s32 %v753_v46, %v749_v48  ;;  %v272_v39 = vsel %vm270_vm14, %v2955_v20, %v271_v23  ;;  %v988_v8 = vsub.s32 4, %v2926_v37 }
 0x192   :  { %vm269_vm0 = vcmp.lt.s32.totalorder %v268_v36, 2  ;;  %v275_v6 = vsel %vm273_vm15, %v274_v47, %v2941_v7  ;;  %vm374_vm1 = vcmp.eq.s32.totalorder %v372_v38, 0  ;;  %v665_v13 = vor.u32 %v664_v55, %v663_v59 }
 0x193   :  { %v985_v12 = vmul.f32 %v984_v56, %v982_v24  ;;  %v755_v4 = vadd.s32 536870912, %v754_v19  ;;  %v276_v21 = vsel %vm269_vm0, %v272_v39, %v275_v6  ;;  %vm373_vm2 = vcmp.lt.s32.totalorder %v372_v38, 2 }
 0x194   :  { %v376_v30 = vsel %vm374_vm1, %v2968_v62, %v375_v54  ;;  %vm377_vm3 = vcmp.eq.s32.totalorder %v372_v38, 2  ;;  %v277_v9 = vsel %vm266_vm12, nan, %v276_v21  ;;  %v152_v7 = vmul.f32 %v2513_v60, %v2330_v14 }
 0x195   :  { %v986_v50 = vxor.u32 2147483648, %v985_v12  ;;  %v3024_v23 = vshrl.u32 %v755_v4, 30  ;;  %v379_v49 = vsel %vm377_vm3, %v378_v44, %v2972_v3  ;;  %v3257_v20 = vand.u32 2147483647, %v2710_v1 }
 0x196   :  { %v989_v62 = vsel %vm904_vm11, %v988_v8, %v2926_v37  ;;  %v380_v5 = vsel %vm373_vm2, %v376_v30, %v379_v49  ;;  %v670_v42 = vand.u32 2147483647, %v669_v52  ;;  %vm370_vm5 = vweird.f32 %v2439_v58 }
 0x197   :  { %vm3033_vm4 = vcmp.le.f32.partialorder %v3257_v20, 0.7853982  ;;  %v987_v10 = vsel %vm904_vm11, %v986_v50, %v985_v12  ;;  %v757_v3 = vshll.u32 %v3024_v23, 30  ;;  %v892_v14 = vand.u32 3, %v2934_v17 }
 0x198   :  { %v990_v59 = vsel %vm3033_vm4, %v2710_v1, %v987_v10  ;;  %v381_v55 = vsel %vm370_vm5, nan, %v380_v5  ;;  %v1010_v41 = vmul.f32 %v2530_v28, %v277_v9  ;;  %v672_v27 = vcvt.s32.f32 %v665_v13 }
 0x199   :  { %v991_v37 = vsel %vm3033_vm4, 0, %v989_v62  ;;  %2237 = vcosq.f32 %v990_v59  ;;  %v758_v51 = vsub.s32 %v754_v19, %v757_v3  ;;  %v895_v43 = vxor.u32 2147483648, %v2978_v57 }
 0x19a   :  { %v898_v18 = vxor.u32 2147483648, %v2976_v26  ;;  %2239 = vsinq.f32 %v990_v59  ;;  %v1011_v58 = vmul.f32 %v2530_v28, %v381_v55  ;;  %v673_v17 = vmul.f32 %v672_v27, %v670_v42 }
 0x19b   :  { %v760_v34 = vsub.s32 0, %v758_v51  ;;  %v995_v48 = vadd.s32 3, %v991_v37  ;;  %v1018_v22 = vadd.f32 %v1010_v41, %v2930_v53  ;;  %vm894_vm6 = vcmp.eq.s32.totalorder %v892_v14, 0 }
 0x19c   :  { %v1019_v36 = vadd.f32 %v1011_v58, %v152_v7  ;;  %vm897_vm7 = vcmp.eq.s32.totalorder %v892_v14, 2  ;;  %v896_v38 = vsel %vm894_vm6, %v2976_v26, %v895_v43  ;;  %v674_v46 = vxor.u32 2147483648, %v673_v17 }
 0x19d   :  { %v1811_v11 = vmin.u32 %v760_v34, %v758_v51  ;;  %v899_v54 = vsel %vm897_vm7, %v898_v18, %v2978_v57  ;;  %vm893_vm8 = vcmp.lt.s32.totalorder %v892_v14, 2  ;;  %v996_v24 = vand.u32 3, %v995_v48 }
 0x19e   :  { %v1043_v56 = vpack.c.bf16 %v1019_v36, %v1018_v22  ;;  %v900_v19 = vsel %vm893_vm8, %v896_v38, %v899_v54  ;;  %vm592_vm9 = vcmp.lt.s32.totalorder %v2641_v40, 0  ;;  %vm890_vm10 = vweird.f32 %v2491_v45 }
 0x19f   :  { %v762_v44 = vclz %v1811_v11  ;;  %v3260_v26 = vand.u32 2147483647, %v2641_v40  ;;  %v675_v52 = vsel %vm592_vm9, %v674_v46, %v673_v17  ;;  %v901_v6 = vsel %vm890_vm10, nan, %v900_v19 }
 0x1a0   :  { %2029 = vmatprep.mubr.bf16.mxu1 %v1043_v56  ;;  %vm1001_vm13 = vcmp.eq.s32.totalorder %v996_v24, 2  ;;  %v750_v12 = vadd.s32 %v2992_v63, %v2990_v61  ;;  %vm997_vm14 = vcmp.lt.s32.totalorder %v996_v24, 2  ;;  %vm998_vm15 = vcmp.eq.s32.totalorder %v996_v24, 0 }
 0x1a1   :  { %v1812_v39 = vadd.s32 4294967294, %v762_v44  ;;  %2030 = vmatmul.mubr.bf16.vlgmr.msra.gmra.mrb[0].mxu1 %v1044_v16  ;;  %vm3064_vm12 = vcmp.le.f32.partialorder %v3260_v26, 0.7853982  ;;  %v1016_v7 = vmul.f32 %v2530_v28, %v901_v6  ;;  %v676_v20 = vsub.s32 4, %v2869_v15 }
 0x1a2   :  { %v678_v21 = vsel %vm3064_vm12, %v2641_v40, %v675_v52  ;;  %vm994_vm0 = vweird.f32 %v2710_v1  ;;  %v157_v5 = vmul.f32 %v2343_v25, %v2513_v60  ;;  %v158_v42 = vmul.f32 %v2347_v32, %v2513_v60 }
 0x1a3   :  { %v2238_v53 = vpop.eup %2237  ;;  %vm1813_vm11 = vcmp.lt.s32.totalorder %v1812_v39, 0  ;;  %2241 = vcosq.f32 %v678_v21  ;;  %v677_v1 = vsel %vm592_vm9, %v676_v20, %v2869_v15  ;;  %vm696_vm1 = vcmp.lt.s32.totalorder %v2843_v29, 0 }
 0x1a4   :  { %v2240_v8 = vpop.eup %2239  ;;  %v1002_v0 = vxor.u32 2147483648, %v2238_v53  ;;  %v765_v2 = vsel %vm1813_vm11, 0, %v1812_v39  ;;  %2243 = vsinq.f32 %v678_v21  ;;  %v1024_v14 = vadd.f32 %v1016_v7, %v157_v5  ;;  %v2198_v21 = vld [vmem:[%s3231_s4 + $0xa8] sm:$0xff]  }
 0x1a5   :  { %v999_v16 = vxor.u32 2147483648, %v2240_v8  ;;  %v766_v45 = vsub.s32 32, %v765_v2  ;;  %v770_v4 = vsub.s32 4294967266, %v765_v2  ;;  %v767_v50 = vshll.u32 %v758_v51, %v765_v2 }
 0x1a6   :  { %v1003_v13 = vsel %vm1001_vm13, %v1002_v0, %v2240_v8  ;;  %v679_v37 = vsel %vm3064_vm12, 0, %v677_v1  ;;  %v780_v51 = vsub.s32 4, %v3024_v23  ;;  %vm695_vm2 = vcmp.le.f32.partialorder %v694_v33, 0.7853982 }
 0x1a7   :  { %v1000_v30 = vsel %vm998_vm15, %v2238_v53, %v999_v16  ;;  %v768_v9 = vshrl.u32 %v750_v12, %v766_v45  ;;  %v771_v49 = vadd.s32 127, %v770_v4  ;;  %v683_v32 = vadd.s32 3, %v679_v37  ;;  %v2191_v45 = vld [vmem:[%s3231_s4 + $0x70] sm:$0xff]   ;;  %v2197_v4 = vld [vmem:[%s3231_s4 + $0xa0] sm:$0xff]  }
 0x1a8   :  { %v1004_v61 = vsel %vm997_vm14, %v1000_v30, %v1003_v13  ;;  %v781_v15 = vsel %vm696_vm1, %v780_v51, %v3024_v23  ;;  %vm682_vm6 = vweird.f32 %v2641_v40  ;;  %vm786_vm10 = vweird.f32 %v2843_v29  ;;  %2049 = vmatprep.subr.bf16.mxu0 %v2191_v45  ;;  %v1822_v13 = vld [vmem:[%s3232_s5] ss:$0 sm:$0xff] }
 0x1a9   :  { %v1005_v63 = vsel %vm994_vm0, nan, %v1004_v61  ;;  %v769_v47 = vor.u32 %v768_v9, %v767_v50  ;;  %v772_v62 = vshll.u32 %v771_v49, 23  ;;  %v684_v48 = vand.u32 3, %v683_v32  ;;  %2050 = vmatpush3.bf16.msra.mxu0 %v2191_v45 }
 0x1aa   :  { %v1017_v10 = vmul.f32 %v2530_v28, %v1005_v63  ;;  %v783_v22 = vsel %vm695_vm2, 0, %v781_v15  ;;  %v155_v6 = vmul.f32 %v2513_v60, %v2345_v31  ;;  %v156_v40 = vmul.f32 %v2513_v60, %v2349_v35  ;;  %v2193_v31 = vld [vmem:[%s3231_s4 + $0x80] sm:$0xff]   ;;  %v2194_v35 = vld [vmem:[%s3231_s4 + $0x88] sm:$0xff]   ;;  %v2195_v60 = vld [vmem:[%s3231_s4 + $0x90] sm:$0xff]  }
 0x1ab   :  { %v773_v3 = vor.u32 4788187, %v772_v62  ;;  %v776_v41 = vcvt.s32.f32 %v769_v47  ;;  %v787_v38 = vadd.s32 3, %v783_v22  ;;  %vm686_vm3 = vcmp.eq.s32.totalorder %v684_v48, 0  ;;  %2061 = vmatprep.subr.bf16.mxu1 %v2193_v31  ;;  %v2202_v22 = vld [vmem:[%s3231_s4 + $0xc8] sm:$0xff]  }
 0x1ac   :  { %v1025_v59 = vadd.f32 %v1017_v10, %v158_v42  ;;  %vm689_vm4 = vcmp.eq.s32.totalorder %v684_v48, 2  ;;  %vm685_vm5 = vcmp.lt.s32.totalorder %v684_v48, 2  ;;  %2062 = vmatpush3.bf16.msra.mxu1 %v2193_v31  ;;  %v2201_v48 = vld [vmem:[%s3231_s4 + $0xc0] sm:$0xff]   ;;  %vm1766_vm12 = vcmask 64512  }
 0x1ad   :  { %v774_v55 = vand.u32 2147483647, %v773_v3  ;;  %v2242_v18 = vpop.eup %2241  ;;  %v788_v46 = vand.u32 3, %v787_v38  ;;  %2063 = vmatprep.subr.bf16.mxu1 %v2194_v35  ;;  %v2205_v38 = vld [vmem:[%s3231_s4 + $0xe0] sm:$0xff]  }
 0x1ae   :  { %v1046_v27 = vpack.c.bf16 %v1025_v59, %v1024_v14  ;;  %v2244_v17 = vpop.eup %2243  ;;  %v690_v11 = vxor.u32 2147483648, %v2242_v18 }
 0x1af   :  { %v777_v25 = vmul.f32 %v776_v41, %v774_v55  ;;  %v687_v36 = vxor.u32 2147483648, %v2244_v17  ;;  %vm793_vm7 = vcmp.eq.s32.totalorder %v788_v46, 2  ;;  %vm790_vm8 = vcmp.eq.s32.totalorder %v788_v46, 0 }
 0x1b0   :  { %v691_v56 = vsel %vm689_vm4, %v690_v11, %v2244_v17  ;;  %vm789_vm9 = vcmp.lt.s32.totalorder %v788_v46, 2  ;;  %2064 = vmatpush3.bf16.msra.mxu1 %v2194_v35  ;;  %v2199_v17 = vld [vmem:[%s3231_s4 + $0xb0] sm:$0xff]   ;;  %v2204_v11 = vld [vmem:[%s3231_s4 + $0xd8] sm:$0xff]  }
 0x1b1   :  { %v778_v43 = vxor.u32 2147483648, %v777_v25  ;;  %v688_v54 = vsel %vm686_vm3, %v2242_v18, %v687_v36  ;;  %2065 = vmatprep.subr.bf16.mxu1 %v2195_v60  ;;  %v2203_v36 = vld [vmem:[%s3231_s4 + $0xd0] sm:$0xff]  }
 0x1b2   :  { %v692_v33 = vsel %vm685_vm5, %v688_v54, %v691_v56  ;;  %v2206_v54 = vld [vmem:[%s3231_s4 + $0xe8] sm:$0xff]   ;;  %v1848_v56 = vld [vmem:[%s3232_s5 + $0x1] ss:$0 sm:$0xff] }
 0x1b3   :  { %v779_v58 = vsel %vm696_vm1, %v778_v43, %v777_v25  ;;  %v693_v19 = vsel %vm682_vm6, nan, %v692_v33 }
 0x1b4   :  { %v782_v34 = vsel %vm695_vm2, %v2843_v29, %v779_v58  ;;  %v1014_v57 = vmul.f32 %v2530_v28, %v693_v19  ;;  %v2192_v29 = vld [vmem:[%s3231_s4 + $0x78] sm:$0xff]   ;;  %2066 = vmatpush3.bf16.msra.mxu1 %v2195_v60 }
 0x1b5   :  { %2245 = vcosq.f32 %v782_v34  ;;  %2051 = vmatprep.subr.bf16.mxu0 %v2192_v29 }
 0x1b6   :  { %2247 = vsinq.f32 %v782_v34  ;;  %v1022_v2 = vadd.f32 %v1014_v57, %v155_v6  ;;  %2052 = vmatpush3.bf16.msra.mxu0 %v2192_v29  ;;  %v2200_v34 = vld [vmem:[%s3231_s4 + $0xb8] sm:$0xff]  }
 0x1b7   :  { %2085 = vmatprep.subr.bf16.mxu0 %v2201_v48 }
 0x1bf   :  { %v2246_v44 = vpop.eup %2245 }
 0x1c0   :  { %v2248_v24 = vpop.eup %2247  ;;  %v794_v23 = vxor.u32 2147483648, %v2246_v44 }
 0x1c1   :  { %v791_v39 = vxor.u32 2147483648, %v2248_v24 }
 0x1c2   :  { %v795_v53 = vsel %vm793_vm7, %v794_v23, %v2248_v24 }
 0x1c3   :  { %v792_v26 = vsel %vm790_vm8, %v2246_v44, %v791_v39 }
 0x1c4   :  { %v796_v52 = vsel %vm789_vm9, %v792_v26, %v795_v53 }
 0x1c5   :  { %v797_v8 = vsel %vm786_vm10, nan, %v796_v52 }
 0x1c6   :  { %v1015_v0 = vmul.f32 %v2530_v28, %v797_v8  ;;  %v2196_v28 = vld [vmem:[%s3231_s4 + $0x98] sm:$0xff]  }
 0x1c7   :  { %2067 = vmatprep.subr.bf16.mxu1 %v2196_v28 }
 0x1c8   :  { %v1023_v16 = vadd.f32 %v1015_v0, %v156_v40  ;;  %2068 = vmatpush3.bf16.msra.mxu1 %v2196_v28 }
 0x1c9   :  { %2069 = vmatprep.subr.bf16.mxu1 %v2197_v4 }
 0x1ca   :  { %v1045_v12 = vpack.c.bf16 %v1023_v16, %v1022_v2 }
 0x1cc   :  { %2033 = vmatprep.mubr.bf16.mxu1 %v1045_v12  ;;  %2070 = vmatpush3.bf16.msra.mxu1 %v2197_v4 }
 0x1cd   :  { %2034 = vmatmul.mubr.bf16.gmra.mrb[4].mxu1 %v1046_v27  ;;  %2071 = vmatprep.subr.bf16.mxu1 %v2198_v21 }
 0x1d0   :  { %2072 = vmatpush3.bf16.msra.mxu1 %v2198_v21 }
 0x1d1   :  { %2073 = vmatprep.subr.bf16.mxu1 %v2199_v17 }
 0x1d4   :  { %2074 = vmatpush3.bf16.msra.mxu1 %v2199_v17 }
 0x1d5   :  { %2075 = vmatprep.subr.bf16.mxu1 %v2200_v34 }
 0x1d8   :  { %2076 = vmatpush3.bf16.msra.mxu1 %v2200_v34 }
 0x274   :  { %v2031_v30 = vpop.f32.mrb[0].mxu1 }
 0x275   :  { %v1144_v50 = vadd.f32 %v2031_v30, %v1822_v13  ;;  %v1135_v9 = vpop.f32.mrb[1].mxu1 }
 0x276   :  { %v1136_v49 = vadd.f32 %v1822_v13, %v1135_v9  ;;  %v2032_v7 = vpop.f32.mrb[2].mxu1  ;;  %v2208_v9 = vld [vmem:[%s3231_s4 + $0xf8] sm:$0xff]  }
 0x277   :  { %v1147_v20 = vadd.f32 %v2032_v7, %v1822_v13  ;;  %v1138_v61 = vpop.f32.mrb[3].mxu1  ;;  %v1168_v47 = vmax.f32 %v1144_v50, 0.0  ;;  %v2207_v50 = vld [vmem:[%s3231_s4 + $0xf0] sm:$0xff]   ;;  %v2210_v7 = vld [vmem:[%s3231_s4 + $0x108] sm:$0xff]  }
 0x278   :  { %v1139_v63 = vadd.f32 %v1822_v13, %v1138_v61  ;;  %v1166_v5 = vmax.f32 %v1136_v49, 0.0  ;;  %v2209_v49 = vld [vmem:[%s3231_s4 + $0x100] sm:$0xff]   ;;  %v2212_v61 = vld [vmem:[%s3231_s4 + $0x118] sm:$0xff]  }
 0x279   :  { %v1169_v62 = vmax.f32 %v1147_v20, 0.0  ;;  %2109 = vmatprep.subr.bf16.mxu1 %v2209_v49  ;;  %v2211_v20 = vld [vmem:[%s3231_s4 + $0x110] sm:$0xff]  }
 0x27a   :  { %v1167_v42 = vmax.f32 %v1139_v63, 0.0  ;;  %v2213_v63 = vld [vmem:[%s3231_s4 + $0x120] sm:$0xff]  }
 0x27b   :  { %v1194_v10 = vpack.c.bf16 %v1169_v62, %v1168_v47  ;;  %v2214_v47 = vld [vmem:[%s3231_s4 + $0x128] sm:$0xff]   ;;  %v1874_v62 = vld [vmem:[%s3232_s5 + $0x2] ss:$0 sm:$0xff] }
 0x27c   :  { %v1193_v3 = vpack.c.bf16 %v1167_v42, %v1166_v5 }
 0x27e   :  { %2053 = vmatprep.mubr.bf16.mxu0 %v1193_v3 }
 0x27f   :  { %2054 = vmatmul.mubr.bf16.vlgmr.msra.gmra.mrb[8].mxu0 %v1194_v10 }
 0x280   :  { %2086 = vmatpush3.bf16.msra.mxu0 %v2201_v48 }
 0x281   :  { %2087 = vmatprep.subr.bf16.mxu0 %v2202_v22 }
 0x284   :  { %2088 = vmatpush3.bf16.msra.mxu0 %v2202_v22 }
 0x285   :  { %2089 = vmatprep.subr.bf16.mxu0 %v2203_v36 }
 0x288   :  { %2090 = vmatpush3.bf16.msra.mxu0 %v2203_v36 }
 0x289   :  { %2091 = vmatprep.subr.bf16.mxu0 %v2204_v11 }
 0x28c   :  { %2092 = vmatpush3.bf16.msra.mxu0 %v2204_v11 }
 0x28d   :  { %2093 = vmatprep.subr.bf16.mxu0 %v2205_v38 }
 0x290   :  { %2094 = vmatpush3.bf16.msra.mxu0 %v2205_v38 }
 0x291   :  { %2095 = vmatprep.subr.bf16.mxu0 %v2206_v54 }
 0x294   :  { %2096 = vmatpush3.bf16.msra.mxu0 %v2206_v54 }
 0x295   :  { %2097 = vmatprep.subr.bf16.mxu0 %v2207_v50 }
 0x298   :  { %2098 = vmatpush3.bf16.msra.mxu0 %v2207_v50 }
 0x299   :  { %2099 = vmatprep.subr.bf16.mxu0 %v2208_v9 }
 0x29c   :  { %2100 = vmatpush3.bf16.msra.mxu0 %v2208_v9 }
 0x2a0   :  { %v2035_v14 = vpop.f32.mrb[4].mxu1 }
 0x2a1   :  { %v1160_v1 = vadd.f32 %v2035_v14, %v1822_v13  ;;  %v1151_v59 = vpop.f32.mrb[5].mxu1 }
 0x2a2   :  { %v1152_v55 = vadd.f32 %v1822_v13, %v1151_v59  ;;  %v2036_v41 = vpop.f32.mrb[6].mxu1 }
 0x2a3   :  { %v1163_v27 = vadd.f32 %v2036_v41, %v1822_v13  ;;  %v1154_v37 = vpop.f32.mrb[7].mxu1  ;;  %v1172_v51 = vmax.f32 %v1160_v1, 0.0 }
 0x2a4   :  { %v1155_v25 = vadd.f32 %v1822_v13, %v1154_v37  ;;  %v1170_v32 = vmax.f32 %v1152_v55, 0.0 }
 0x2a5   :  { %v1173_v43 = vmax.f32 %v1163_v27, 0.0 }
 0x2a6   :  { %v1171_v18 = vmax.f32 %v1155_v25, 0.0 }
 0x2a7   :  { %v1196_v58 = vpack.c.bf16 %v1173_v43, %v1172_v51 }
 0x2a8   :  { %v1195_v15 = vpack.c.bf16 %v1171_v18, %v1170_v32 }
 0x2aa   :  { %2057 = vmatprep.mubr.bf16.mxu0 %v1195_v15 }
 0x2ab   :  { %2058 = vmatmul.mubr.bf16.gmra.mrb[12].mxu0 %v1196_v58 }
 0x352   :  { %v2055_v46 = vpop.f32.mrb[8].mxu0 }
 0x353   :  { %v1294_v33 = vadd.f32 %v2055_v46, %v1848_v56  ;;  %v1285_v44 = vpop.f32.mrb[9].mxu0 }
 0x354   :  { %v1286_v24 = vadd.f32 %v1848_v56, %v1285_v44  ;;  %v2056_v23 = vpop.f32.mrb[10].mxu0  ;;  %v2216_v44 = vld [vmem:[%s3231_s4 + $0x138] sm:$0xff]  }
 0x355   :  { %v1297_v19 = vadd.f32 %v2056_v23, %v1848_v56  ;;  %v1288_v39 = vpop.f32.mrb[11].mxu0  ;;  %v1318_v26 = vmax.f32 %v1294_v33, 0.0  ;;  %v2215_v33 = vld [vmem:[%s3231_s4 + $0x130] sm:$0xff]  }
 0x356   :  { %v1289_v53 = vadd.f32 %v1848_v56, %v1288_v39  ;;  %v1316_v52 = vmax.f32 %v1286_v24, 0.0  ;;  %v1900_v24 = vld [vmem:[%s3232_s5 + $0x3] ss:$0 sm:$0xff] }
 0x357   :  { %v1319_v57 = vmax.f32 %v1297_v19, 0.0 }
 0x358   :  { %v1317_v8 = vmax.f32 %v1289_v53, 0.0 }
 0x359   :  { %v1344_v6 = vpack.c.bf16 %v1319_v57, %v1318_v26 }
 0x35a   :  { %v1343_v40 = vpack.c.bf16 %v1317_v8, %v1316_v52 }
 0x35c   :  { %2077 = vmatprep.mubr.bf16.mxu1 %v1343_v40 }
 0x35d   :  { %2078 = vmatmul.mubr.bf16.vlgmr.msra.gmra.mrb[8].mxu1 %v1344_v6 }
 0x35e   :  { %2110 = vmatpush3.bf16.msra.mxu1 %v2209_v49 }
 0x35f   :  { %2111 = vmatprep.subr.bf16.mxu1 %v2210_v7 }
 0x362   :  { %2112 = vmatpush3.bf16.msra.mxu1 %v2210_v7 }
 0x363   :  { %2113 = vmatprep.subr.bf16.mxu1 %v2211_v20 }
 0x366   :  { %2114 = vmatpush3.bf16.msra.mxu1 %v2211_v20  ;;  %v1926_v20 = vld [vmem:[%s3232_s5 + $0x4] ss:$0 sm:$0xff] }
 0x367   :  { %2115 = vmatprep.subr.bf16.mxu1 %v2212_v61 }
 0x36a   :  { %2116 = vmatpush3.bf16.msra.mxu1 %v2212_v61 }
 0x36b   :  { %2117 = vmatprep.subr.bf16.mxu1 %v2213_v63 }
 0x36e   :  { %2118 = vmatpush3.bf16.msra.mxu1 %v2213_v63 }
 0x36f   :  { %2119 = vmatprep.subr.bf16.mxu1 %v2214_v47 }
 0x372   :  { %2120 = vmatpush3.bf16.msra.mxu1 %v2214_v47 }
 0x373   :  { %2121 = vmatprep.subr.bf16.mxu1 %v2215_v33 }
 0x376   :  { %2122 = vmatpush3.bf16.msra.mxu1 %v2215_v33 }
 0x377   :  { %2123 = vmatprep.subr.bf16.mxu1 %v2216_v44 }
 0x37a   :  { %2124 = vmatpush3.bf16.msra.mxu1 %v2216_v44 }
 0x37e   :  { %v2059_v0 = vpop.f32.mrb[12].mxu0 }
 0x37f   :  { %v1310_v2 = vadd.f32 %v2059_v0, %v1848_v56  ;;  %v1301_v16 = vpop.f32.mrb[13].mxu0 }
 0x380   :  { %v1302_v12 = vadd.f32 %v1848_v56, %v1301_v16  ;;  %v2060_v45 = vpop.f32.mrb[14].mxu0 }
 0x381   :  { %v1313_v29 = vadd.f32 %v2060_v45, %v1848_v56  ;;  %v1304_v31 = vpop.f32.mrb[15].mxu0  ;;  %v1322_v60 = vmax.f32 %v1310_v2, 0.0 }
 0x382   :  { %v1305_v35 = vadd.f32 %v1848_v56, %v1304_v31  ;;  %v1320_v4 = vmax.f32 %v1302_v12, 0.0 }
 0x383   :  { %v1323_v28 = vmax.f32 %v1313_v29, 0.0 }
 0x384   :  { %v1321_v21 = vmax.f32 %v1305_v35, 0.0 }
 0x385   :  { %v1346_v13 = vpack.c.bf16 %v1323_v28, %v1322_v60 }
 0x386   :  { %v1345_v30 = vpack.c.bf16 %v1321_v21, %v1320_v4 }
 0x388   :  { %2081 = vmatprep.mubr.bf16.mxu1 %v1345_v30 }
 0x389   :  { %2082 = vmatmul.mubr.bf16.gmra.mrb[12].mxu1 %v1346_v13 }
 0x430   :  { %v2079_v5 = vpop.f32.mrb[8].mxu1 }
 0x431   :  { %v1444_v42 = vadd.f32 %v2079_v5, %v1874_v62  ;;  %v1435_v10 = vpop.f32.mrb[9].mxu1 }
 0x432   :  { %v1436_v3 = vadd.f32 %v1874_v62, %v1435_v10  ;;  %v2080_v14 = vpop.f32.mrb[10].mxu1 }
 0x433   :  { %v1447_v1 = vadd.f32 %v2080_v14, %v1874_v62  ;;  %v1438_v59 = vpop.f32.mrb[11].mxu1  ;;  %v1468_v41 = vmax.f32 %v1444_v42, 0.0 }
 0x434   :  { %v1439_v55 = vadd.f32 %v1874_v62, %v1438_v59  ;;  %v1466_v37 = vmax.f32 %v1436_v3, 0.0 }
 0x435   :  { %v1469_v27 = vmax.f32 %v1447_v1, 0.0 }
 0x436   :  { %v1467_v25 = vmax.f32 %v1439_v55, 0.0 }
 0x437   :  { %v1494_v51 = vpack.c.bf16 %v1469_v27, %v1468_v41 }
 0x438   :  { %v1493_v43 = vpack.c.bf16 %v1467_v25, %v1466_v37 }
 0x43a   :  { %2101 = vmatprep.mubr.bf16.mxu0 %v1493_v43 }
 0x43b   :  { %2102 = vmatmul.mubr.bf16.vlgmr.msra.gmra.mrb[16].mxu0 %v1494_v51 }
 0x45c   :  { %v2083_v32 = vpop.f32.mrb[12].mxu1 }
 0x45d   :  { %v1460_v18 = vadd.f32 %v2083_v32, %v1874_v62  ;;  %v1451_v58 = vpop.f32.mrb[13].mxu1 }
 0x45e   :  { %v1452_v15 = vadd.f32 %v1874_v62, %v1451_v58  ;;  %v2084_v17 = vpop.f32.mrb[14].mxu1 }
 0x45f   :  { %v1463_v34 = vadd.f32 %v2084_v17, %v1874_v62  ;;  %v1454_v48 = vpop.f32.mrb[15].mxu1  ;;  %v1472_v36 = vmax.f32 %v1460_v18, 0.0 }
 0x460   :  { %v1455_v22 = vadd.f32 %v1874_v62, %v1454_v48  ;;  %v1470_v38 = vmax.f32 %v1452_v15, 0.0 }
 0x461   :  { %v1473_v11 = vmax.f32 %v1463_v34, 0.0 }
 0x462   :  { %v1471_v54 = vmax.f32 %v1455_v22, 0.0 }
 0x463   :  { %v1496_v56 = vpack.c.bf16 %v1473_v11, %v1472_v36 }
 0x464   :  { %v1495_v46 = vpack.c.bf16 %v1471_v54, %v1470_v38 }
 0x466   :  { %2105 = vmatprep.mubr.bf16.mxu0 %v1495_v46 }
 0x467   :  { %2106 = vmatmul.mubr.bf16.gmra.mrb[20].mxu0 %v1496_v56 }
 0x50e   :  { %v2103_v23 = vpop.f32.mrb[16].mxu0 }
 0x50f   :  { %v1594_v19 = vadd.f32 %v2103_v23, %v1900_v24  ;;  %v1585_v39 = vpop.f32.mrb[17].mxu0 }
 0x510   :  { %v1586_v53 = vadd.f32 %v1900_v24, %v1585_v39  ;;  %v2104_v26 = vpop.f32.mrb[18].mxu0 }
 0x511   :  { %v1597_v57 = vadd.f32 %v2104_v26, %v1900_v24  ;;  %v1588_v52 = vpop.f32.mrb[19].mxu0  ;;  %v1618_v6 = vmax.f32 %v1594_v19, 0.0 }
 0x512   :  { %v1589_v8 = vadd.f32 %v1900_v24, %v1588_v52  ;;  %v1616_v0 = vmax.f32 %v1586_v53, 0.0 }
 0x513   :  { %v1619_v40 = vmax.f32 %v1597_v57, 0.0 }
 0x514   :  { %v1617_v2 = vmax.f32 %v1589_v8, 0.0 }
 0x515   :  { %v1644_v16 = vpack.c.bf16 %v1619_v40, %v1618_v6 }
 0x516   :  { %v1643_v12 = vpack.c.bf16 %v1617_v2, %v1616_v0 }
 0x518   :  { %2125 = vmatprep.mubr.bf16.mxu1 %v1643_v12 }
 0x519   :  { %2126 = vmatmul.mubr.bf16.vlgmr.msra.gmra.mrb[16].mxu1 %v1644_v16 }
 0x53a   :  { %v2107_v45 = vpop.f32.mrb[20].mxu0 }
 0x53b   :  { %v1610_v29 = vadd.f32 %v2107_v45, %v1900_v24  ;;  %v1601_v31 = vpop.f32.mrb[21].mxu0 }
 0x53c   :  { %v1602_v35 = vadd.f32 %v1900_v24, %v1601_v31  ;;  %v2108_v60 = vpop.f32.mrb[22].mxu0 }
 0x53d   :  { %v1613_v28 = vadd.f32 %v2108_v60, %v1900_v24  ;;  %v1604_v4 = vpop.f32.mrb[23].mxu0  ;;  %v1622_v13 = vmax.f32 %v1610_v29, 0.0 }
 0x53e   :  { %v1605_v21 = vadd.f32 %v1900_v24, %v1604_v4  ;;  %v1620_v50 = vmax.f32 %v1602_v35, 0.0 }
 0x53f   :  { %v1623_v30 = vmax.f32 %v1613_v28, 0.0 }
 0x540   :  { %v1621_v9 = vmax.f32 %v1605_v21, 0.0 }
 0x541   :  { %v1646_v49 = vpack.c.bf16 %v1623_v30, %v1622_v13 }
 0x542   :  { %v1645_v7 = vpack.c.bf16 %v1621_v9, %v1620_v50 }
 0x544   :  { %2129 = vmatprep.mubr.bf16.mxu1 %v1645_v7 }
 0x545   :  { %2130 = vmatmul.mubr.bf16.gmra.mrb[20].mxu1 %v1646_v49 }
 0x5ec   :  { %v2127_v61 = vpop.f32.mrb[16].mxu1 }
 0x5ed   :  { %v1744_v63 = vadd.f32 %v2127_v61, %v1926_v20  ;;  %v1735_v47 = vpop.f32.mrb[17].mxu1 }
 0x5ee   :  { %v1736_v62 = vadd.f32 %v1926_v20, %v1735_v47  ;;  %v2128_v5 = vpop.f32.mrb[18].mxu1 }
 0x5ef   :  { %1769 = vst.msk [vmem:[%s3233_s6 + $0x10] sm:$0xff] %vm1766_vm12, %v1744_v63  ;;  %v1747_v42 = vadd.f32 %v2128_v5, %v1926_v20  ;;  %v1738_v10 = vpop.f32.mrb[19].mxu1 }
 0x5f0   :  { %1767 = vst.msk [vmem:[%s3233_s6] sm:$0xff] %vm1766_vm12, %v1736_v62  ;;  %v1739_v3 = vadd.f32 %v1926_v20, %v1738_v10 }
 0x5f1   :  { %1770 = vst.msk [vmem:[%s3233_s6 + $0x18] sm:$0xff] %vm1766_vm12, %v1747_v42 }
 0x5f2   :  { %1768 = vst.msk [vmem:[%s3233_s6 + $0x8] sm:$0xff] %vm1766_vm12, %v1739_v3 }
 0x618   :  { %v2131_v14 = vpop.f32.mrb[20].mxu1 }
 0x619   :  { %v1760_v1 = vadd.f32 %v2131_v14, %v1926_v20  ;;  %v1751_v59 = vpop.f32.mrb[21].mxu1 }
 0x61a   :  { %v1752_v55 = vadd.f32 %v1926_v20, %v1751_v59  ;;  %v2132_v41 = vpop.f32.mrb[22].mxu1 }
 0x61b   :  { %1773 = vst.msk [vmem:[%s3233_s6 + $0x30] sm:$0xff] %vm1766_vm12, %v1760_v1  ;;  %v1763_v27 = vadd.f32 %v2132_v41, %v1926_v20  ;;  %v1754_v37 = vpop.f32.mrb[23].mxu1 }
 0x61c   :  { %1771 = vst.msk [vmem:[%s3233_s6 + $0x20] sm:$0xff] %vm1766_vm12, %v1752_v55  ;;  %v1755_v25 = vadd.f32 %v1926_v20, %v1754_v37 }
 0x61d   :  { %1774 = vst.msk [vmem:[%s3233_s6 + $0x38] sm:$0xff] %vm1766_vm12, %v1763_v27 }
 0x61e   :  { %1772 = vst.msk [vmem:[%s3233_s6 + $0x28] sm:$0xff] %vm1766_vm12, %v1755_v25 }

</bundles_post_ra>
